<compile_context>
chip_gen: v5e
topology: v5e:2x2
jax: 0.10.0
libtpu: 0.0.40
codegen_flags: <defaults>
</compile_context>

<pallas_src>
import functools
import math

import jax
import jax.numpy as jnp
from jax.experimental import pallas as pl
from jax.experimental.pallas import tpu as pltpu

LN_EPS = 1e-12                      # models.LayerNorm variance_epsilon
_SQRT_HALF = 1.0 / math.sqrt(2.0)
_VMEM_LIMIT = 48 * 1024 * 1024      # explicit scoped-VMEM budget (< v7x 64 MiB physical)


# ----------------------------------------------------------------------------- tiling

def _round_up(x, m):
    return (x + m - 1) // m * m


def _pick_tile(dim, target, align):
    """Largest multiple of `align` that divides `dim` and is <= target, else full dim."""
    if dim <= target:
        return dim
    t = (target // align) * align
    while t >= align:
        if dim % t == 0:
            return t
        t -= align
    return dim


# ----------------------------------------------------------------------------- kernels

def _linear_kernel(x_ref, w_ref, b_ref, o_ref, *, act):
    """o = act(x @ w + b); full K and full N per block (weight resident across grid)."""
    y = jnp.dot(x_ref[...], w_ref[...], preferred_element_type=jnp.float32)
    y = y + b_ref[...].astype(jnp.float32)
    if act == "tanh":
        y = jnp.tanh(y)
    elif act == "gelu":
        # exact erf-based gelu, matching models.gelu (torch.erf version)
        y = y * 0.5 * (1.0 + jax.lax.erf(y * _SQRT_HALF))
    o_ref[...] = y.astype(o_ref.dtype)


def _linear_add_ln_kernel(x_ref, w_ref, b_ref, r_ref, g_ref, beta_ref, o_ref, *, eps):
    """Fused  o = LayerNorm(x @ w + b + residual)  — post-LN transformer sublayer."""
    y = jnp.dot(x_ref[...], w_ref[...], preferred_element_type=jnp.float32)
    y = y + b_ref[...].astype(jnp.float32) + r_ref[...].astype(jnp.float32)
    u = jnp.mean(y, axis=-1, keepdims=True)
    s = jnp.mean(jnp.square(y - u), axis=-1, keepdims=True)
    yn = (y - u) * jax.lax.rsqrt(s + eps)
    o_ref[...] = (yn * g_ref[...] + beta_ref[...]).astype(o_ref.dtype)


def _linear_t_kernel(x_ref, w_ref, b_ref, o_ref):
    """o = x @ w.T + b with w block (TN, K); used by the vocab-tiled MLM decoder."""
    y = jax.lax.dot_general(x_ref[...], w_ref[...], (((1,), (1,)), ((), ())),
                            preferred_element_type=jnp.float32)
    o_ref[...] = (y + b_ref[...].astype(jnp.float32)).astype(o_ref.dtype)


def _layernorm_kernel(x_ref, g_ref, b_ref, o_ref, *, eps):
    x = x_ref[...].astype(jnp.float32)
    u = jnp.mean(x, axis=-1, keepdims=True)
    s = jnp.mean(jnp.square(x - u), axis=-1, keepdims=True)
    xn = (x - u) * jax.lax.rsqrt(s + eps)
    o_ref[...] = (xn * g_ref[...] + b_ref[...]).astype(o_ref.dtype)


def _embed_ln_kernel(tok_ref, pos_ref, seg_ref, g_ref, b_ref, o_ref, *, eps):
    """Fused  o = LayerNorm(tok + pos + seg)  — no f32 (B,S,D) sum round-trips HBM."""
    x = (tok_ref[0].astype(jnp.float32)
         + pos_ref[...].astype(jnp.float32)
         + seg_ref[0].astype(jnp.float32))
    u = jnp.mean(x, axis=-1, keepdims=True)
    s = jnp.mean(jnp.square(x - u), axis=-1, keepdims=True)
    xn = (x - u) * jax.lax.rsqrt(s + eps)
    o_ref[0] = (xn * g_ref[...] + b_ref[...]).astype(o_ref.dtype)


def _attn_kernel(qkv_ref, bias_ref, o_ref, *, n_heads, d_head, scale):
    """Multi-head attention for one batch element from the fused (S, 3D) slab."""
    qkv = qkv_ref[0]                    # (S, 3*D) bf16
    bias = bias_ref[0]                  # (1, S)   f32 additive mask (-10000 on pads)
    d_model = n_heads * d_head

    def head_ctx(h):
        lo = h * d_head
        q = qkv[:, lo:lo + d_head] * scale          # fold 1/sqrt(dk) into bf16 q
        k = qkv[:, d_model + lo:d_model + lo + d_head]
        v = qkv[:, 2 * d_model + lo:2 * d_model + lo + d_head]
        s = jax.lax.dot_general(q, k, (((1,), (1,)), ((), ())),
                                preferred_element_type=jnp.float32) + bias
        m = jnp.max(s, axis=-1, keepdims=True)
        e = jnp.exp(s - m)                          # f32 softmax (v5e-safe)
        p = e * pl.reciprocal(jnp.sum(e, axis=-1, keepdims=True), approx=True)
        return jnp.dot(p.astype(v.dtype), v, preferred_element_type=jnp.float32)

    # heads written straight into the output block in 2*d_head-lane aligned pairs
    # (128 lanes at BERT-base) — no H-way concatenate, no f32 context slab.
    h = 0
    while h < n_heads:
        lo = h * d_head
        if h + 1 < n_heads:
            pair = jnp.concatenate([head_ctx(h), head_ctx(h + 1)], axis=-1)
            o_ref[0, :, lo:lo + 2 * d_head] = pair.astype(o_ref.dtype)
            h += 2
        else:
            o_ref[0, :, lo:lo + d_head] = head_ctx(h).astype(o_ref.dtype)
            h += 1


# ----------------------------------------------------------------------------- wrappers

def pallas_linear(x, w, b, act="none", *, out_dtype=jnp.bfloat16, tm=512):
    """act(x @ w + b): 1-D grid over rows; whole (K, N) weight stays VMEM-resident."""
    M, K = x.shape
    N = w.shape[1]
    TM = _pick_tile(M, tm, 8)
    cost = pl.CostEstimate(
        flops=2 * M * N * K,
        transcendentals=M * N if act in ("gelu", "tanh") else 0,
        bytes_accessed=int(M * K * x.dtype.itemsize + K * N * w.dtype.itemsize
                           + N * 4 + M * N * jnp.dtype(out_dtype).itemsize))
    return pl.pallas_call(
        functools.partial(_linear_kernel, act=act),
        out_shape=jax.ShapeDtypeStruct((M, N), out_dtype),
        grid=(M // TM,),
        in_specs=[pl.BlockSpec((TM, K), lambda i: (i, 0)),
                  pl.BlockSpec((K, N), lambda i: (0, 0)),      # constant -> resident
                  pl.BlockSpec((1, N), lambda i: (0, 0))],
        out_specs=pl.BlockSpec((TM, N), lambda i: (i, 0)),
        compiler_params=pltpu.CompilerParams(
            dimension_semantics=("parallel",), vmem_limit_bytes=_VMEM_LIMIT),
        cost_estimate=cost,
    )(x, w, b.reshape(1, N))


def pallas_linear_add_ln(x, w, b, residual, g, beta, *, out_dtype=jnp.bfloat16, tm=512):
    """LayerNorm(x @ w + b + residual) in one pass (wo / w2 sublayers)."""
    M, K = x.shape
    N = w.shape[1]
    TM = _pick_tile(M, tm, 8)
    cost = pl.CostEstimate(
        flops=2 * M * N * K + 8 * M * N, transcendentals=0,
        bytes_accessed=int(M * K * x.dtype.itemsize + K * N * w.dtype.itemsize
                           + M * N * residual.dtype.itemsize
                           + M * N * jnp.dtype(out_dtype).itemsize))
    return pl.pallas_call(
        functools.partial(_linear_add_ln_kernel, eps=LN_EPS),
        out_shape=jax.ShapeDtypeStruct((M, N), out_dtype),
        grid=(M // TM,),
        in_specs=[pl.BlockSpec((TM, K), lambda i: (i, 0)),
                  pl.BlockSpec((K, N), lambda i: (0, 0)),      # constant -> resident
                  pl.BlockSpec((1, N), lambda i: (0, 0)),
                  pl.BlockSpec((TM, N), lambda i: (i, 0)),     # residual
                  pl.BlockSpec((1, N), lambda i: (0, 0)),
                  pl.BlockSpec((1, N), lambda i: (0, 0))],
        out_specs=pl.BlockSpec((TM, N), lambda i: (i, 0)),
        compiler_params=pltpu.CompilerParams(
            dimension_semantics=("parallel",), vmem_limit_bytes=_VMEM_LIMIT),
        cost_estimate=cost,
    )(x, w, b.reshape(1, N), residual, g.reshape(1, N), beta.reshape(1, N))


def pallas_decoder(x, tok_embed, dec_b, *, tn=1024, out_dtype=jnp.float32):
    """MLM decoder: x @ tok_embed.T + b, vocab axis padded to a 256-aligned tile and
    streamed once; the small (M, D) activation block stays resident."""
    M, K = x.shape
    V = tok_embed.shape[0]
    if V <= tn:
        V_pad = _round_up(V, 128)
        TN = V_pad
    else:
        TN = tn
        V_pad = _round_up(V, TN)
    if V_pad != V:
        # TODO(synk): pre-pad tok_embed / dec_b once at parameter-load time instead of
        # per forward call (one extra HBM copy of the embedding table per step here).
        tok_embed = jnp.pad(tok_embed, ((0, V_pad - V), (0, 0)))
        dec_b = jnp.pad(dec_b, (0, V_pad - V))
    cost = pl.CostEstimate(
        flops=2 * M * V_pad * K, transcendentals=0,
        bytes_accessed=int(M * K * x.dtype.itemsize + V_pad * K * tok_embed.dtype.itemsize
                           + V_pad * 4 + M * V_pad * jnp.dtype(out_dtype).itemsize))
    out = pl.pallas_call(
        _linear_t_kernel,
        out_shape=jax.ShapeDtypeStruct((M, V_pad), out_dtype),
        grid=(V_pad // TN,),
        in_specs=[pl.BlockSpec((M, K), lambda j: (0, 0)),      # activations resident
                  pl.BlockSpec((TN, K), lambda j: (j, 0)),     # weight streamed once
                  pl.BlockSpec((1, TN), lambda j: (0, j))],
        out_specs=pl.BlockSpec((M, TN), lambda j: (0, j)),
        compiler_params=pltpu.CompilerParams(
            dimension_semantics=("parallel",), vmem_limit_bytes=_VMEM_LIMIT),
        cost_estimate=cost,
    )(x, tok_embed, dec_b.reshape(1, V_pad))
    return out[:, :V] if V_pad != V else out


def pallas_layernorm(x, g, b, *, out_dtype=jnp.bfloat16, tm=1024):
    M, D = x.shape
    TM = _pick_tile(M, tm, 8)
    return pl.pallas_call(
        functools.partial(_layernorm_kernel, eps=LN_EPS),
        out_shape=jax.ShapeDtypeStruct((M, D), out_dtype),
        grid=(M // TM,),
        in_specs=[pl.BlockSpec((TM, D), lambda i: (i, 0)),
                  pl.BlockSpec((1, D), lambda i: (0, 0)),
                  pl.BlockSpec((1, D), lambda i: (0, 0))],
        out_specs=pl.BlockSpec((TM, D), lambda i: (i, 0)),
        compiler_params=pltpu.CompilerParams(dimension_semantics=("parallel",)),
    )(x, g.reshape(1, D), b.reshape(1, D))


def pallas_embed_layernorm(tok_e, pos_e, seg_e, g, b, *, out_dtype=jnp.bfloat16, ts=512):
    """LayerNorm(tok + pos + seg); pos is (S, D) and is never replicated over batch."""
    B, S, D = tok_e.shape
    TS = _pick_tile(S, ts, 8)
    return pl.pallas_call(
        functools.partial(_embed_ln_kernel, eps=LN_EPS),
        out_shape=jax.ShapeDtypeStruct((B, S, D), out_dtype),
        grid=(B, S // TS),
        in_specs=[pl.BlockSpec((1, TS, D), lambda bi, si: (bi, si, 0)),
                  pl.BlockSpec((TS, D), lambda bi, si: (si, 0)),
                  pl.BlockSpec((1, TS, D), lambda bi, si: (bi, si, 0)),
                  pl.BlockSpec((1, D), lambda bi, si: (0, 0)),
                  pl.BlockSpec((1, D), lambda bi, si: (0, 0))],
        out_specs=pl.BlockSpec((1, TS, D), lambda bi, si: (bi, si, 0)),
        compiler_params=pltpu.CompilerParams(dimension_semantics=("parallel", "parallel")),
    )(tok_e, pos_e, seg_e, g.reshape(1, D), b.reshape(1, D))


def pallas_attention(qkv, mask_bias, n_heads, d_head):
    """qkv: (B, S, 3D) fused projections. mask_bias: (B, 1, S) additive f32."""
    B, S, three_d = qkv.shape
    d_model = n_heads * d_head
    return pl.pallas_call(
        functools.partial(_attn_kernel, n_heads=n_heads, d_head=d_head,
                          scale=1.0 / math.sqrt(d_head)),
        out_shape=jax.ShapeDtypeStruct((B, S, d_model), jnp.bfloat16),
        grid=(B,),
        in_specs=[pl.BlockSpec((1, S, three_d), lambda bi: (bi, 0, 0)),
                  pl.BlockSpec((1, 1, S), lambda bi: (bi, 0, 0))],
        out_specs=pl.BlockSpec((1, S, d_model), lambda bi: (bi, 0, 0)),
        compiler_params=pltpu.CompilerParams(dimension_semantics=("parallel",)),
    )(qkv, mask_bias)


# ----------------------------------------------------------------------------- model

def init_params(key, cfg):
    V, D, L = cfg["vocab"], cfg["dim"], cfg["n_layers"]
    F, ML, NS = cfg["dim_ff"], cfg["max_len"], cfg["n_segments"]
    keys = jax.random.split(key, 256)
    it = iter(range(256))
    nk = lambda: keys[next(it)]

    def nrm(k, shape, dtype=jnp.bfloat16):
        return (jax.random.normal(k, shape, jnp.float32) * 0.02).astype(dtype)

    p = {
        "tok_embed": nrm(nk(), (V, D)),                 # bf16: also the MLM decoder weight
        "pos_embed": nrm(nk(), (ML, D), jnp.float32),
        "seg_embed": nrm(nk(), (NS, D), jnp.float32),
        "emb_ln_g": jnp.ones((D,), jnp.float32),
        "emb_ln_b": jnp.zeros((D,), jnp.float32),
        "layers": [],
    }
    for _ in range(L):
        p["layers"].append({
            # Q, K, V projections fused into one (D, 3D) matmul
            "wqkv": nrm(nk(), (D, 3 * D)), "bqkv": nrm(nk(), (3 * D,), jnp.float32),
            "wo": nrm(nk(), (D, D)), "bo": nrm(nk(), (D,), jnp.float32),
            "ln1_g": jnp.ones((D,), jnp.float32), "ln1_b": jnp.zeros((D,), jnp.float32),
            "w1": nrm(nk(), (D, F)), "b1": nrm(nk(), (F,), jnp.float32),
            "w2": nrm(nk(), (F, D)), "b2": nrm(nk(), (D,), jnp.float32),
            "ln2_g": jnp.ones((D,), jnp.float32), "ln2_b": jnp.zeros((D,), jnp.float32),
        })
    p["fc_w"] = nrm(nk(), (D, D)); p["fc_b"] = nrm(nk(), (D,), jnp.float32)
    p["lin_w"] = nrm(nk(), (D, D)); p["lin_b"] = nrm(nk(), (D,), jnp.float32)
    p["norm_g"] = jnp.ones((D,), jnp.float32); p["norm_b"] = jnp.zeros((D,), jnp.float32)
    p["cls_w"] = nrm(nk(), (D, 2)); p["cls_b"] = nrm(nk(), (2,), jnp.float32)
    p["dec_b"] = jnp.zeros((V,), jnp.float32)
    return p


def bert_pretrain_forward(params, input_ids, segment_ids, input_mask, masked_pos, cfg):
    B, S = input_ids.shape
    D, H = cfg["dim"], cfg["n_heads"]
    dk = D // H

    # ---- Embeddings: data-dependent table lookups stay in XLA; sum + LN fused in Pallas ----
    tok_e = params["tok_embed"][input_ids]                     # (B, S, D) bf16 gather
    pos_e = params["pos_embed"][:S]                            # (S, D)    f32
    seg_e = params["seg_embed"][segment_ids]                   # (B, S, D) f32 gather
    h = pallas_embed_layernorm(tok_e, pos_e, seg_e,
                               params["emb_ln_g"], params["emb_ln_b"]).reshape(B * S, D)

    # additive attention bias, computed once and reused by every layer (no B*H replication)
    mask_bias = (-10000.0 * (1.0 - input_mask.astype(jnp.float32))).reshape(B, 1, S)

    # ---- Transformer blocks (post-LN); residual+LN fused into the wo / w2 matmuls ----
    for lp in params["layers"]:
        qkv = pallas_linear(h, lp["wqkv"], lp["bqkv"])                       # (B*S, 3D)
        attn = pallas_attention(qkv.reshape(B, S, 3 * D), mask_bias, H, dk)  # (B, S, D)
        h = pallas_linear_add_ln(attn.reshape(B * S, D), lp["wo"], lp["bo"],
                                 h, lp["ln1_g"], lp["ln1_b"])
        ff = pallas_linear(h, lp["w1"], lp["b1"], act="gelu")
        h = pallas_linear_add_ln(ff, lp["w2"], lp["b2"],
                                 h, lp["ln2_g"], lp["ln2_b"])

    h3 = h.reshape(B, S, D)

    # ---- Pooled / NSP head ----
    pooled = pallas_linear(h3[:, 0, :], params["fc_w"], params["fc_b"], act="tanh")
    logits_clsf = pallas_linear(pooled, params["cls_w"], params["cls_b"],
                                out_dtype=jnp.float32)

    # ---- Masked LM head ----
    hm = jnp.take_along_axis(h3, masked_pos[:, :, None], axis=1)   # (B, P, D) gather glue
    P = hm.shape[1]
    hm2 = pallas_linear(hm.reshape(B * P, D), params["lin_w"], params["lin_b"], act="gelu")
    hm2 = pallas_layernorm(hm2, params["norm_g"], params["norm_b"])
    logits_lm = pallas_decoder(hm2, params["tok_embed"], params["dec_b"]).reshape(B, P, -1)

    return logits_lm, logits_clsf


# ----------------------------------------------------------------------------- main

if __name__ == "__main__":
    cfg = dict(vocab=64, dim=32, n_layers=2, n_heads=4, dim_ff=64,
               max_len=32, n_segments=2)
    B, S, P = 2, 8, 4

    key = jax.random.PRNGKey(0)
    kp, k_ids, k_pos = jax.random.split(key, 3)
    params = init_params(kp, cfg)

    input_ids = jax.random.randint(k_ids, (B, S), 0, cfg["vocab"], dtype=jnp.int32)
    segment_ids = jnp.concatenate(
        [jnp.zeros((B, S // 2), jnp.int32), jnp.ones((B, S // 2), jnp.int32)], axis=1)
    input_mask = jnp.ones((B, S), jnp.int32).at[:, -1].set(0)   # last token padded
    masked_pos = jax.random.randint(k_pos, (B, P), 0, S, dtype=jnp.int32)

    fwd = jax.jit(functools.partial(bert_pretrain_forward, cfg=cfg))
    logits_lm, logits_clsf = fwd(params, input_ids, segment_ids, input_mask, masked_pos)
    jax.block_until_ready((logits_lm, logits_clsf))

    assert logits_lm.shape == (B, P, cfg["vocab"]), logits_lm.shape
    assert logits_clsf.shape == (B, 2), logits_clsf.shape
    assert bool(jnp.all(jnp.isfinite(logits_lm))) and bool(jnp.all(jnp.isfinite(logits_clsf)))
    print("KERNEL_OK")
</pallas_src>

<mosaic_0001>
module attributes {stable_mosaic.version = 11 : i64} {
  func.func @_linear_kernel(%arg0: i32, %arg1: memref<16x32xbf16, #tpu.memory_space<vmem>>, %arg2: memref<32x96xbf16, #tpu.memory_space<vmem>>, %arg3: memref<1x96xf32, #tpu.memory_space<vmem>>, %arg4: memref<16x96xbf16, #tpu.memory_space<vmem>>) attributes {dimension_semantics = [#tpu.dimension_semantics<parallel>], iteration_bounds = array<i64: 1>, scalar_prefetch = 0 : i64, scratch_operands = 0 : i64, tpu.core_type = #tpu.core_type<tc>, window_params = [{transform_indices = @transform_0, window_bounds = array<i64: 16, 32>}, {pipeline_mode = #tpu.pipeline_mode<synchronous>, transform_indices = @transform_1, window_bounds = array<i64: 32, 96>}, {pipeline_mode = #tpu.pipeline_mode<synchronous>, transform_indices = @transform_2, window_bounds = array<i64: 1, 96>}, {transform_indices = @transform_3, window_bounds = array<i64: 16, 96>}]} {
    %c0 = arith.constant 0 : index
    %c0_0 = arith.constant 0 : index
    %0 = vector.load %arg1[%c0, %c0_0] : memref<16x32xbf16, #tpu.memory_space<vmem>>, vector<16x32xbf16>
    %c0_1 = arith.constant 0 : index
    %c0_2 = arith.constant 0 : index
    %1 = vector.load %arg2[%c0_1, %c0_2] : memref<32x96xbf16, #tpu.memory_space<vmem>>, vector<32x96xbf16>
    %cst = arith.constant dense<0.000000e+00> : vector<16x96xf32>
    %2 = tpu.matmul %0, %1, %cst {dimension_numbers = #tpu.dot_dimension_numbers<[1], [0], [0], [1], [0, 0, 1, 1], [], []>} : vector<16x32xbf16>, vector<32x96xbf16>, vector<16x96xf32> -> vector<16x96xf32>
    %c0_3 = arith.constant 0 : index
    %c0_4 = arith.constant 0 : index
    %3 = vector.load %arg3[%c0_3, %c0_4] : memref<1x96xf32, #tpu.memory_space<vmem>>, vector<1x96xf32>
    %4 = vector.broadcast %3 : vector<1x96xf32> to vector<16x96xf32>
    %5 = arith.addf %2, %4 : vector<16x96xf32>
    %6 = arith.truncf %5 : vector<16x96xf32> to vector<16x96xbf16>
    %c0_5 = arith.constant 0 : index
    %c0_6 = arith.constant 0 : index
    %7 = vector.load %arg4[%c0_5, %c0_6] : memref<16x96xbf16, #tpu.memory_space<vmem>>, vector<16x96xbf16>
    tpu.vector_store %arg4[%c0_5, %c0_6], %6 {strides = array<i32>} : memref<16x96xbf16, #tpu.memory_space<vmem>>, vector<16x96xbf16>,
    return
  }
  func.func @transform_0(%arg0: i32) -> (i32, i32) {
    %c0_i32 = arith.constant 0 : i32
    %c0_i32_0 = arith.constant 0 : i32
    return %arg0, %c0_i32 : i32, i32
  }
  func.func @transform_1(%arg0: i32) -> (i32, i32) {
    %c0_i32 = arith.constant 0 : i32
    %c0_i32_0 = arith.constant 0 : i32
    %c0_i32_1 = arith.constant 0 : i32
    return %c0_i32, %c0_i32_0 : i32, i32
  }
  func.func @transform_2(%arg0: i32) -> (i32, i32) {
    %c0_i32 = arith.constant 0 : i32
    %c0_i32_0 = arith.constant 0 : i32
    %c0_i32_1 = arith.constant 0 : i32
    return %c0_i32, %c0_i32_0 : i32, i32
  }
  func.func @transform_3(%arg0: i32) -> (i32, i32) {
    %c0_i32 = arith.constant 0 : i32
    %c0_i32_0 = arith.constant 0 : i32
    return %arg0, %c0_i32 : i32, i32
  }
}

module attributes {stable_mosaic.version = 11 : i64} {
  func.func @_embed_ln_kernel(%arg0: i32, %arg1: i32, %arg2: memref<1x8x32xbf16, #tpu.memory_space<vmem>>, %arg3: memref<8x32xf32, #tpu.memory_space<vmem>>, %arg4: memref<1x8x32xf32, #tpu.memory_space<vmem>>, %arg5: memref<1x32xf32, #tpu.memory_space<vmem>>, %arg6: memref<1x32xf32, #tpu.memory_space<vmem>>, %arg7: memref<1x8x32xbf16, #tpu.memory_space<vmem>>) attributes {dimension_semantics = [#tpu.dimension_semantics<parallel>, #tpu.dimension_semantics<parallel>], iteration_bounds = array<i64: 2, 1>, scalar_prefetch = 0 : i64, scratch_operands = 0 : i64, tpu.core_type = #tpu.core_type<tc>, window_params = [{transform_indices = @transform_0, window_bounds = array<i64: 1, 8, 32>}, {transform_indices = @transform_1, window_bounds = array<i64: 8, 32>}, {transform_indices = @transform_2, window_bounds = array<i64: 1, 8, 32>}, {pipeline_mode = #tpu.pipeline_mode<synchronous>, transform_indices = @transform_3, window_bounds = array<i64: 1, 32>}, {pipeline_mode = #tpu.pipeline_mode<synchronous>, transform_indices = @transform_4, window_bounds = array<i64: 1, 32>}, {transform_indices = @transform_5, window_bounds = array<i64: 1, 8, 32>}]} {
    %c0 = arith.constant 0 : index
    %c0_0 = arith.constant 0 : index
    %c0_1 = arith.constant 0 : index
    %0 = vector.load %arg2[%c0, %c0_0, %c0_1] : memref<1x8x32xbf16, #tpu.memory_space<vmem>>, vector<1x8x32xbf16>
    %1 = vector.shape_cast %0 : vector<1x8x32xbf16> to vector<8x32xbf16>
    %2 = arith.extf %1 : vector<8x32xbf16> to vector<8x32xf32>
    %c0_2 = arith.constant 0 : index
    %c0_3 = arith.constant 0 : index
    %3 = vector.load %arg3[%c0_2, %c0_3] : memref<8x32xf32, #tpu.memory_space<vmem>>, vector<8x32xf32>
    %4 = arith.addf %2, %3 : vector<8x32xf32>
    %c0_4 = arith.constant 0 : index
    %c0_5 = arith.constant 0 : index
    %c0_6 = arith.constant 0 : index
    %5 = vector.load %arg4[%c0_4, %c0_5, %c0_6] : memref<1x8x32xf32, #tpu.memory_space<vmem>>, vector<1x8x32xf32>
    %6 = vector.shape_cast %5 : vector<1x8x32xf32> to vector<8x32xf32>
    %7 = arith.addf %4, %6 : vector<8x32xf32>
    %cst = arith.constant dense<0.000000e+00> : vector<8xf32>
    %8 = vector.multi_reduction <add>, %7, %cst [1] : vector<8x32xf32> to vector<8xf32>
    %9 = vector.shape_cast %8 : vector<8xf32> to vector<8x1xf32>
    %cst_7 = arith.constant 3.200000e+01 : f32
    %10 = vector.broadcast %cst_7 : f32 to vector<8x1xf32>
    %11 = arith.divf %9, %10 : vector<8x1xf32>
    %12 = vector.broadcast %11 : vector<8x1xf32> to vector<8x32xf32>
    %13 = arith.subf %7, %12 : vector<8x32xf32>
    %14 = arith.mulf %13, %13 : vector<8x32xf32>
    %cst_8 = arith.constant dense<0.000000e+00> : vector<8xf32>
    %15 = vector.multi_reduction <add>, %14, %cst_8 [1] : vector<8x32xf32> to vector<8xf32>
    %16 = vector.shape_cast %15 : vector<8xf32> to vector<8x1xf32>
    %cst_9 = arith.constant 3.200000e+01 : f32
    %17 = vector.broadcast %cst_9 : f32 to vector<8x1xf32>
    %18 = arith.divf %16, %17 : vector<8x1xf32>
    %19 = vector.broadcast %11 : vector<8x1xf32> to vector<8x32xf32>
    %20 = arith.subf %7, %19 : vector<8x32xf32>
    %cst_10 = arith.constant 9.99999996E-13 : f32
    %21 = vector.broadcast %cst_10 : f32 to vector<8x1xf32>
    %22 = arith.addf %18, %21 : vector<8x1xf32>
    %23 = math.rsqrt %22 : vector<8x1xf32>
    %24 = vector.broadcast %23 : vector<8x1xf32> to vector<8x32xf32>
    %25 = arith.mulf %20, %24 : vector<8x32xf32>
    %c0_11 = arith.constant 0 : index
    %c0_12 = arith.constant 0 : index
    %26 = vector.load %arg5[%c0_11, %c0_12] : memref<1x32xf32, #tpu.memory_space<vmem>>, vector<1x32xf32>
    %27 = vector.broadcast %26 : vector<1x32xf32> to vector<8x32xf32>
    %28 = arith.mulf %25, %27 : vector<8x32xf32>
    %c0_13 = arith.constant 0 : index
    %c0_14 = arith.constant 0 : index
    %29 = vector.load %arg6[%c0_13, %c0_14] : memref<1x32xf32, #tpu.memory_space<vmem>>, vector<1x32xf32>
    %30 = vector.broadcast %29 : vector<1x32xf32> to vector<8x32xf32>
    %31 = arith.addf %28, %30 : vector<8x32xf32>
    %32 = arith.truncf %31 : vector<8x32xf32> to vector<8x32xbf16>
    %c0_15 = arith.constant 0 : index
    %c0_16 = arith.constant 0 : index
    %c0_17 = arith.constant 0 : index
    %33 = vector.load %arg7[%c0_15, %c0_16, %c0_17] : memref<1x8x32xbf16, #tpu.memory_space<vmem>>, vector<1x8x32xbf16>
    %34 = vector.shape_cast %33 : vector<1x8x32xbf16> to vector<8x32xbf16>
    %35 = vector.shape_cast %32 : vector<8x32xbf16> to vector<1x8x32xbf16>
    tpu.vector_store %arg7[%c0_15, %c0_16, %c0_17], %35 {strides = array<i32>} : memref<1x8x32xbf16, #tpu.memory_space<vmem>>, vector<1x8x32xbf16>,
    return
  }
  func.func @transform_0(%arg0: i32, %arg1: i32) -> (i32, i32, i32) {
    %c0_i32 = arith.constant 0 : i32
    %c0_i32_0 = arith.constant 0 : i32
    return %arg0, %arg1, %c0_i32 : i32, i32, i32
  }
  func.func @transform_1(%arg0: i32, %arg1: i32) -> (i32, i32) {
    %c0_i32 = arith.constant 0 : i32
    %c0_i32_0 = arith.constant 0 : i32
    return %arg1, %c0_i32 : i32, i32
  }
  func.func @transform_2(%arg0: i32, %arg1: i32) -> (i32, i32, i32) {
    %c0_i32 = arith.constant 0 : i32
    %c0_i32_0 = arith.constant 0 : i32
    return %arg0, %arg1, %c0_i32 : i32, i32, i32
  }
  func.func @transform_3(%arg0: i32, %arg1: i32) -> (i32, i32) {
    %c0_i32 = arith.constant 0 : i32
    %c0_i32_0 = arith.constant 0 : i32
    %c0_i32_1 = arith.constant 0 : i32
    return %c0_i32, %c0_i32_0 : i32, i32
  }
  func.func @transform_4(%arg0: i32, %arg1: i32) -> (i32, i32) {
    %c0_i32 = arith.constant 0 : i32
    %c0_i32_0 = arith.constant 0 : i32
    %c0_i32_1 = arith.constant 0 : i32
    return %c0_i32, %c0_i32_0 : i32, i32
  }
  func.func @transform_5(%arg0: i32, %arg1: i32) -> (i32, i32, i32) {
    %c0_i32 = arith.constant 0 : i32
    %c0_i32_0 = arith.constant 0 : i32
    return %arg0, %arg1, %c0_i32 : i32, i32, i32
  }
}

module attributes {stable_mosaic.version = 11 : i64} {
  func.func @_attn_kernel(%arg0: i32, %arg1: memref<1x8x96xbf16, #tpu.memory_space<vmem>>, %arg2: memref<1x1x8xf32, #tpu.memory_space<vmem>>, %arg3: memref<1x8x32xbf16, #tpu.memory_space<vmem>>) attributes {dimension_semantics = [#tpu.dimension_semantics<parallel>], iteration_bounds = array<i64: 2>, scalar_prefetch = 0 : i64, scratch_operands = 0 : i64, tpu.core_type = #tpu.core_type<tc>, window_params = [{transform_indices = @transform_0, window_bounds = array<i64: 1, 8, 96>}, {transform_indices = @transform_1, window_bounds = array<i64: 1, 1, 8>}, {transform_indices = @transform_2, window_bounds = array<i64: 1, 8, 32>}]} {
    %c0 = arith.constant 0 : index
    %c0_0 = arith.constant 0 : index
    %c0_1 = arith.constant 0 : index
    %0 = vector.load %arg1[%c0, %c0_0, %c0_1] : memref<1x8x96xbf16, #tpu.memory_space<vmem>>, vector<1x8x96xbf16>
    %1 = vector.shape_cast %0 : vector<1x8x96xbf16> to vector<8x96xbf16>
    %c0_2 = arith.constant 0 : index
    %c0_3 = arith.constant 0 : index
    %c0_4 = arith.constant 0 : index
    %2 = vector.load %arg2[%c0_2, %c0_3, %c0_4] : memref<1x1x8xf32, #tpu.memory_space<vmem>>, vector<1x1x8xf32>
    %3 = vector.shape_cast %2 : vector<1x1x8xf32> to vector<1x8xf32>
    %4 = vector.extract_strided_slice %1 {offsets = [0, 0], sizes = [8, 8], strides = [1, 1]} : vector<8x96xbf16> to vector<8x8xbf16>
    %cst = arith.constant 3.535160e-01 : bf16
    %5 = vector.broadcast %cst : bf16 to vector<8x8xbf16>
    %6 = arith.mulf %4, %5 : vector<8x8xbf16>
    %7 = vector.extract_strided_slice %1 {offsets = [0, 32], sizes = [8, 8], strides = [1, 1]} : vector<8x96xbf16> to vector<8x8xbf16>
    %8 = vector.extract_strided_slice %1 {offsets = [0, 64], sizes = [8, 8], strides = [1, 1]} : vector<8x96xbf16> to vector<8x8xbf16>
    %cst_5 = arith.constant dense<0.000000e+00> : vector<8x8xf32>
    %9 = tpu.matmul %6, %7, %cst_5 {dimension_numbers = #tpu.dot_dimension_numbers<[1], [1], [0], [0], [0, 0, 1, 0], [], []>} : vector<8x8xbf16>, vector<8x8xbf16>, vector<8x8xf32> -> vector<8x8xf32>
    %10 = vector.broadcast %3 : vector<1x8xf32> to vector<8x8xf32>
    %11 = arith.addf %9, %10 : vector<8x8xf32>
    %cst_6 = arith.constant dense<0xFF800000> : vector<8xf32>
    %12 = vector.multi_reduction <maximumf>, %11, %cst_6 [1] : vector<8x8xf32> to vector<8xf32>
    %13 = vector.shape_cast %12 : vector<8xf32> to vector<8x1xf32>
    %14 = vector.broadcast %13 : vector<8x1xf32> to vector<8x8xf32>
    %15 = arith.subf %11, %14 : vector<8x8xf32>
    %16 = math.exp %15 : vector<8x8xf32>
    %cst_7 = arith.constant dense<0.000000e+00> : vector<8xf32>
    %17 = vector.multi_reduction <add>, %16, %cst_7 [1] : vector<8x8xf32> to vector<8xf32>
    %18 = vector.shape_cast %17 : vector<8xf32> to vector<8x1xf32>
    %19 = tpu.reciprocal %18 {approx = true} : vector<8x1xf32> -> vector<8x1xf32>
    %20 = vector.broadcast %19 : vector<8x1xf32> to vector<8x8xf32>
    %21 = arith.mulf %16, %20 : vector<8x8xf32>
    %22 = arith.truncf %21 : vector<8x8xf32> to vector<8x8xbf16>
    %cst_8 = arith.constant dense<0.000000e+00> : vector<8x8xf32>
    %23 = tpu.matmul %22, %8, %cst_8 {dimension_numbers = #tpu.dot_dimension_numbers<[1], [0], [0], [1], [0, 0, 1, 1], [], []>} : vector<8x8xbf16>, vector<8x8xbf16>, vector<8x8xf32> -> vector<8x8xf32>
    %24 = vector.extract_strided_slice %1 {offsets = [0, 8], sizes = [8, 8], strides = [1, 1]} : vector<8x96xbf16> to vector<8x8xbf16>
    %cst_9 = arith.constant 3.535160e-01 : bf16
    %25 = vector.broadcast %cst_9 : bf16 to vector<8x8xbf16>
    %26 = arith.mulf %24, %25 : vector<8x8xbf16>
    %27 = vector.extract_strided_slice %1 {offsets = [0, 40], sizes = [8, 8], strides = [1, 1]} : vector<8x96xbf16> to vector<8x8xbf16>
    %28 = vector.extract_strided_slice %1 {offsets = [0, 72], sizes = [8, 8], strides = [1, 1]} : vector<8x96xbf16> to vector<8x8xbf16>
    %cst_10 = arith.constant dense<0.000000e+00> : vector<8x8xf32>
    %29 = tpu.matmul %26, %27, %cst_10 {dimension_numbers = #tpu.dot_dimension_numbers<[1], [1], [0], [0], [0, 0, 1, 0], [], []>} : vector<8x8xbf16>, vector<8x8xbf16>, vector<8x8xf32> -> vector<8x8xf32>
    %30 = vector.broadcast %3 : vector<1x8xf32> to vector<8x8xf32>
    %31 = arith.addf %29, %30 : vector<8x8xf32>
    %cst_11 = arith.constant dense<0xFF800000> : vector<8xf32>
    %32 = vector.multi_reduction <maximumf>, %31, %cst_11 [1] : vector<8x8xf32> to vector<8xf32>
    %33 = vector.shape_cast %32 : vector<8xf32> to vector<8x1xf32>
    %34 = vector.broadcast %33 : vector<8x1xf32> to vector<8x8xf32>
    %35 = arith.subf %31, %34 : vector<8x8xf32>
    %36 = math.exp %35 : vector<8x8xf32>
    %cst_12 = arith.constant dense<0.000000e+00> : vector<8xf32>
    %37 = vector.multi_reduction <add>, %36, %cst_12 [1] : vector<8x8xf32> to vector<8xf32>
    %38 = vector.shape_cast %37 : vector<8xf32> to vector<8x1xf32>
    %39 = tpu.reciprocal %38 {approx = true} : vector<8x1xf32> -> vector<8x1xf32>
    %40 = vector.broadcast %39 : vector<8x1xf32> to vector<8x8xf32>
    %41 = arith.mulf %36, %40 : vector<8x8xf32>
    %42 = arith.truncf %41 : vector<8x8xf32> to vector<8x8xbf16>
    %cst_13 = arith.constant dense<0.000000e+00> : vector<8x8xf32>
    %43 = tpu.matmul %42, %28, %cst_13 {dimension_numbers = #tpu.dot_dimension_numbers<[1], [0], [0], [1], [0, 0, 1, 1], [], []>} : vector<8x8xbf16>, vector<8x8xbf16>, vector<8x8xf32> -> vector<8x8xf32>
    %44 = tpu.concatenate %23, %43 in 1 : vector<8x8xf32>, vector<8x8xf32> -> vector<8x16xf32>
    %45 = arith.truncf %44 : vector<8x16xf32> to vector<8x16xbf16>
    %c0_14 = arith.constant 0 : index
    %c0_15 = arith.constant 0 : index
    %c0_16 = arith.constant 0 : index
    %46 = vector.load %arg3[%c0_14, %c0_15, %c0_16] : memref<1x8x32xbf16, #tpu.memory_space<vmem>>, vector<1x8x16xbf16>
    %47 = vector.shape_cast %46 : vector<1x8x16xbf16> to vector<8x16xbf16>
    %48 = vector.shape_cast %45 : vector<8x16xbf16> to vector<1x8x16xbf16>
    tpu.vector_store %arg3[%c0_14, %c0_15, %c0_16], %48 {strides = array<i32>} : memref<1x8x32xbf16, #tpu.memory_space<vmem>>, vector<1x8x16xbf16>,
    %49 = vector.extract_strided_slice %1 {offsets = [0, 16], sizes = [8, 8], strides = [1, 1]} : vector<8x96xbf16> to vector<8x8xbf16>
    %cst_17 = arith.constant 3.535160e-01 : bf16
    %50 = vector.broadcast %cst_17 : bf16 to vector<8x8xbf16>
    %51 = arith.mulf %49, %50 : vector<8x8xbf16>
    %52 = vector.extract_strided_slice %1 {offsets = [0, 48], sizes = [8, 8], strides = [1, 1]} : vector<8x96xbf16> to vector<8x8xbf16>
    %53 = vector.extract_strided_slice %1 {offsets = [0, 80], sizes = [8, 8], strides = [1, 1]} : vector<8x96xbf16> to vector<8x8xbf16>
    %cst_18 = arith.constant dense<0.000000e+00> : vector<8x8xf32>
    %54 = tpu.matmul %51, %52, %cst_18 {dimension_numbers = #tpu.dot_dimension_numbers<[1], [1], [0], [0], [0, 0, 1, 0], [], []>} : vector<8x8xbf16>, vector<8x8xbf16>, vector<8x8xf32> -> vector<8x8xf32>
    %55 = vector.broadcast %3 : vector<1x8xf32> to vector<8x8xf32>
    %56 = arith.addf %54, %55 : vector<8x8xf32>
    %cst_19 = arith.constant dense<0xFF800000> : vector<8xf32>
    %57 = vector.multi_reduction <maximumf>, %56, %cst_19 [1] : vector<8x8xf32> to vector<8xf32>
    %58 = vector.shape_cast %57 : vector<8xf32> to vector<8x1xf32>
    %59 = vector.broadcast %58 : vector<8x1xf32> to vector<8x8xf32>
    %60 = arith.subf %56, %59 : vector<8x8xf32>
    %61 = math.exp %60 : vector<8x8xf32>
    %cst_20 = arith.constant dense<0.000000e+00> : vector<8xf32>
    %62 = vector.multi_reduction <add>, %61, %cst_20 [1] : vector<8x8xf32> to vector<8xf32>
    %63 = vector.shape_cast %62 : vector<8xf32> to vector<8x1xf32>
    %64 = tpu.reciprocal %63 {approx = true} : vector<8x1xf32> -> vector<8x1xf32>
    %65 = vector.broadcast %64 : vector<8x1xf32> to vector<8x8xf32>
    %66 = arith.mulf %61, %65 : vector<8x8xf32>
    %67 = arith.truncf %66 : vector<8x8xf32> to vector<8x8xbf16>
    %cst_21 = arith.constant dense<0.000000e+00> : vector<8x8xf32>
    %68 = tpu.matmul %67, %53, %cst_21 {dimension_numbers = #tpu.dot_dimension_numbers<[1], [0], [0], [1], [0, 0, 1, 1], [], []>} : vector<8x8xbf16>, vector<8x8xbf16>, vector<8x8xf32> -> vector<8x8xf32>
    %69 = vector.extract_strided_slice %1 {offsets = [0, 24], sizes = [8, 8], strides = [1, 1]} : vector<8x96xbf16> to vector<8x8xbf16>
    %cst_22 = arith.constant 3.535160e-01 : bf16
    %70 = vector.broadcast %cst_22 : bf16 to vector<8x8xbf16>
    %71 = arith.mulf %69, %70 : vector<8x8xbf16>
    %72 = vector.extract_strided_slice %1 {offsets = [0, 56], sizes = [8, 8], strides = [1, 1]} : vector<8x96xbf16> to vector<8x8xbf16>
    %73 = vector.extract_strided_slice %1 {offsets = [0, 88], sizes = [8, 8], strides = [1, 1]} : vector<8x96xbf16> to vector<8x8xbf16>
    %cst_23 = arith.constant dense<0.000000e+00> : vector<8x8xf32>
    %74 = tpu.matmul %71, %72, %cst_23 {dimension_numbers = #tpu.dot_dimension_numbers<[1], [1], [0], [0], [0, 0, 1, 0], [], []>} : vector<8x8xbf16>, vector<8x8xbf16>, vector<8x8xf32> -> vector<8x8xf32>
    %75 = vector.broadcast %3 : vector<1x8xf32> to vector<8x8xf32>
    %76 = arith.addf %74, %75 : vector<8x8xf32>
    %cst_24 = arith.constant dense<0xFF800000> : vector<8xf32>
    %77 = vector.multi_reduction <maximumf>, %76, %cst_24 [1] : vector<8x8xf32> to vector<8xf32>
    %78 = vector.shape_cast %77 : vector<8xf32> to vector<8x1xf32>
    %79 = vector.broadcast %78 : vector<8x1xf32> to vector<8x8xf32>
    %80 = arith.subf %76, %79 : vector<8x8xf32>
    %81 = math.exp %80 : vector<8x8xf32>
    %cst_25 = arith.constant dense<0.000000e+00> : vector<8xf32>
    %82 = vector.multi_reduction <add>, %81, %cst_25 [1] : vector<8x8xf32> to vector<8xf32>
    %83 = vector.shape_cast %82 : vector<8xf32> to vector<8x1xf32>
    %84 = tpu.reciprocal %83 {approx = true} : vector<8x1xf32> -> vector<8x1xf32>
    %85 = vector.broadcast %84 : vector<8x1xf32> to vector<8x8xf32>
    %86 = arith.mulf %81, %85 : vector<8x8xf32>
    %87 = arith.truncf %86 : vector<8x8xf32> to vector<8x8xbf16>
    %cst_26 = arith.constant dense<0.000000e+00> : vector<8x8xf32>
    %88 = tpu.matmul %87, %73, %cst_26 {dimension_numbers = #tpu.dot_dimension_numbers<[1], [0], [0], [1], [0, 0, 1, 1], [], []>} : vector<8x8xbf16>, vector<8x8xbf16>, vector<8x8xf32> -> vector<8x8xf32>
    %89 = tpu.concatenate %68, %88 in 1 : vector<8x8xf32>, vector<8x8xf32> -> vector<8x16xf32>
    %90 = arith.truncf %89 : vector<8x16xf32> to vector<8x16xbf16>
    %c0_27 = arith.constant 0 : index
    %c0_28 = arith.constant 0 : index
    %c16 = arith.constant 16 : index
    %91 = vector.load %arg3[%c0_27, %c0_28, %c16] : memref<1x8x32xbf16, #tpu.memory_space<vmem>>, vector<1x8x16xbf16>
    %92 = vector.shape_cast %91 : vector<1x8x16xbf16> to vector<8x16xbf16>
    %93 = vector.shape_cast %90 : vector<8x16xbf16> to vector<1x8x16xbf16>
    tpu.vector_store %arg3[%c0_27, %c0_28, %c16], %93 {strides = array<i32>} : memref<1x8x32xbf16, #tpu.memory_space<vmem>>, vector<1x8x16xbf16>,
    return
  }
  func.func @transform_0(%arg0: i32) -> (i32, i32, i32) {
    %c0_i32 = arith.constant 0 : i32
    %c0_i32_0 = arith.constant 0 : i32
    %c0_i32_1 = arith.constant 0 : i32
    return %arg0, %c0_i32, %c0_i32_0 : i32, i32, i32
  }
  func.func @transform_1(%arg0: i32) -> (i32, i32, i32) {
    %c0_i32 = arith.constant 0 : i32
    %c0_i32_0 = arith.constant 0 : i32
    %c0_i32_1 = arith.constant 0 : i32
    return %arg0, %c0_i32, %c0_i32_0 : i32, i32, i32
  }
  func.func @transform_2(%arg0: i32) -> (i32, i32, i32) {
    %c0_i32 = arith.constant 0 : i32
    %c0_i32_0 = arith.constant 0 : i32
    %c0_i32_1 = arith.constant 0 : i32
    return %arg0, %c0_i32, %c0_i32_0 : i32, i32, i32
  }
}

module attributes {stable_mosaic.version = 11 : i64} {
  func.func @_linear_add_ln_kernel(%arg0: i32, %arg1: memref<16x32xbf16, #tpu.memory_space<vmem>>, %arg2: memref<32x32xbf16, #tpu.memory_space<vmem>>, %arg3: memref<1x32xf32, #tpu.memory_space<vmem>>, %arg4: memref<16x32xbf16, #tpu.memory_space<vmem>>, %arg5: memref<1x32xf32, #tpu.memory_space<vmem>>, %arg6: memref<1x32xf32, #tpu.memory_space<vmem>>, %arg7: memref<16x32xbf16, #tpu.memory_space<vmem>>) attributes {dimension_semantics = [#tpu.dimension_semantics<parallel>], iteration_bounds = array<i64: 1>, scalar_prefetch = 0 : i64, scratch_operands = 0 : i64, tpu.core_type = #tpu.core_type<tc>, window_params = [{transform_indices = @transform_0, window_bounds = array<i64: 16, 32>}, {pipeline_mode = #tpu.pipeline_mode<synchronous>, transform_indices = @transform_1, window_bounds = array<i64: 32, 32>}, {pipeline_mode = #tpu.pipeline_mode<synchronous>, transform_indices = @transform_2, window_bounds = array<i64: 1, 32>}, {transform_indices = @transform_3, window_bounds = array<i64: 16, 32>}, {pipeline_mode = #tpu.pipeline_mode<synchronous>, transform_indices = @transform_4, window_bounds = array<i64: 1, 32>}, {pipeline_mode = #tpu.pipeline_mode<synchronous>, transform_indices = @transform_5, window_bounds = array<i64: 1, 32>}, {transform_indices = @transform_6, window_bounds = array<i64: 16, 32>}]} {
    %c0 = arith.constant 0 : index
    %c0_0 = arith.constant 0 : index
    %0 = vector.load %arg1[%c0, %c0_0] : memref<16x32xbf16, #tpu.memory_space<vmem>>, vector<16x32xbf16>
    %c0_1 = arith.constant 0 : index
    %c0_2 = arith.constant 0 : index
    %1 = vector.load %arg2[%c0_1, %c0_2] : memref<32x32xbf16, #tpu.memory_space<vmem>>, vector<32x32xbf16>
    %cst = arith.constant dense<0.000000e+00> : vector<16x32xf32>
    %2 = tpu.matmul %0, %1, %cst {dimension_numbers = #tpu.dot_dimension_numbers<[1], [0], [0], [1], [0, 0, 1, 1], [], []>} : vector<16x32xbf16>, vector<32x32xbf16>, vector<16x32xf32> -> vector<16x32xf32>
    %c0_3 = arith.constant 0 : index
    %c0_4 = arith.constant 0 : index
    %3 = vector.load %arg3[%c0_3, %c0_4] : memref<1x32xf32, #tpu.memory_space<vmem>>, vector<1x32xf32>
    %4 = vector.broadcast %3 : vector<1x32xf32> to vector<16x32xf32>
    %5 = arith.addf %2, %4 : vector<16x32xf32>
    %c0_5 = arith.constant 0 : index
    %c0_6 = arith.constant 0 : index
    %6 = vector.load %arg4[%c0_5, %c0_6] : memref<16x32xbf16, #tpu.memory_space<vmem>>, vector<16x32xbf16>
    %7 = arith.extf %6 : vector<16x32xbf16> to vector<16x32xf32>
    %8 = arith.addf %5, %7 : vector<16x32xf32>
    %cst_7 = arith.constant dense<0.000000e+00> : vector<16xf32>
    %9 = vector.multi_reduction <add>, %8, %cst_7 [1] : vector<16x32xf32> to vector<16xf32>
    %10 = vector.shape_cast %9 : vector<16xf32> to vector<16x1xf32>
    %cst_8 = arith.constant 3.200000e+01 : f32
    %11 = vector.broadcast %cst_8 : f32 to vector<16x1xf32>
    %12 = arith.divf %10, %11 : vector<16x1xf32>
    %13 = vector.broadcast %12 : vector<16x1xf32> to vector<16x32xf32>
    %14 = arith.subf %8, %13 : vector<16x32xf32>
    %15 = arith.mulf %14, %14 : vector<16x32xf32>
    %cst_9 = arith.constant dense<0.000000e+00> : vector<16xf32>
    %16 = vector.multi_reduction <add>, %15, %cst_9 [1] : vector<16x32xf32> to vector<16xf32>
    %17 = vector.shape_cast %16 : vector<16xf32> to vector<16x1xf32>
    %cst_10 = arith.constant 3.200000e+01 : f32
    %18 = vector.broadcast %cst_10 : f32 to vector<16x1xf32>
    %19 = arith.divf %17, %18 : vector<16x1xf32>
    %20 = vector.broadcast %12 : vector<16x1xf32> to vector<16x32xf32>
    %21 = arith.subf %8, %20 : vector<16x32xf32>
    %cst_11 = arith.constant 9.99999996E-13 : f32
    %22 = vector.broadcast %cst_11 : f32 to vector<16x1xf32>
    %23 = arith.addf %19, %22 : vector<16x1xf32>
    %24 = math.rsqrt %23 : vector<16x1xf32>
    %25 = vector.broadcast %24 : vector<16x1xf32> to vector<16x32xf32>
    %26 = arith.mulf %21, %25 : vector<16x32xf32>
    %c0_12 = arith.constant 0 : index
    %c0_13 = arith.constant 0 : index
    %27 = vector.load %arg5[%c0_12, %c0_13] : memref<1x32xf32, #tpu.memory_space<vmem>>, vector<1x32xf32>
    %28 = vector.broadcast %27 : vector<1x32xf32> to vector<16x32xf32>
    %29 = arith.mulf %26, %28 : vector<16x32xf32>
    %c0_14 = arith.constant 0 : index
    %c0_15 = arith.constant 0 : index
    %30 = vector.load %arg6[%c0_14, %c0_15] : memref<1x32xf32, #tpu.memory_space<vmem>>, vector<1x32xf32>
    %31 = vector.broadcast %30 : vector<1x32xf32> to vector<16x32xf32>
    %32 = arith.addf %29, %31 : vector<16x32xf32>
    %33 = arith.truncf %32 : vector<16x32xf32> to vector<16x32xbf16>
    %c0_16 = arith.constant 0 : index
    %c0_17 = arith.constant 0 : index
    %34 = vector.load %arg7[%c0_16, %c0_17] : memref<16x32xbf16, #tpu.memory_space<vmem>>, vector<16x32xbf16>
    tpu.vector_store %arg7[%c0_16, %c0_17], %33 {strides = array<i32>} : memref<16x32xbf16, #tpu.memory_space<vmem>>, vector<16x32xbf16>,
    return
  }
  func.func @transform_0(%arg0: i32) -> (i32, i32) {
    %c0_i32 = arith.constant 0 : i32
    %c0_i32_0 = arith.constant 0 : i32
    return %arg0, %c0_i32 : i32, i32
  }
  func.func @transform_1(%arg0: i32) -> (i32, i32) {
    %c0_i32 = arith.constant 0 : i32
    %c0_i32_0 = arith.constant 0 : i32
    %c0_i32_1 = arith.constant 0 : i32
    return %c0_i32, %c0_i32_0 : i32, i32
  }
  func.func @transform_2(%arg0: i32) -> (i32, i32) {
    %c0_i32 = arith.constant 0 : i32
    %c0_i32_0 = arith.constant 0 : i32
    %c0_i32_1 = arith.constant 0 : i32
    return %c0_i32, %c0_i32_0 : i32, i32
  }
  func.func @transform_3(%arg0: i32) -> (i32, i32) {
    %c0_i32 = arith.constant 0 : i32
    %c0_i32_0 = arith.constant 0 : i32
    return %arg0, %c0_i32 : i32, i32
  }
  func.func @transform_4(%arg0: i32) -> (i32, i32) {
    %c0_i32 = arith.constant 0 : i32
    %c0_i32_0 = arith.constant 0 : i32
    %c0_i32_1 = arith.constant 0 : i32
    return %c0_i32, %c0_i32_0 : i32, i32
  }
  func.func @transform_5(%arg0: i32) -> (i32, i32) {
    %c0_i32 = arith.constant 0 : i32
    %c0_i32_0 = arith.constant 0 : i32
    %c0_i32_1 = arith.constant 0 : i32
    return %c0_i32, %c0_i32_0 : i32, i32
  }
  func.func @transform_6(%arg0: i32) -> (i32, i32) {
    %c0_i32 = arith.constant 0 : i32
    %c0_i32_0 = arith.constant 0 : i32
    return %arg0, %c0_i32 : i32, i32
  }
}

module attributes {stable_mosaic.version = 11 : i64} {
  func.func @_linear_kernel(%arg0: i32, %arg1: memref<16x32xbf16, #tpu.memory_space<vmem>>, %arg2: memref<32x64xbf16, #tpu.memory_space<vmem>>, %arg3: memref<1x64xf32, #tpu.memory_space<vmem>>, %arg4: memref<16x64xbf16, #tpu.memory_space<vmem>>) attributes {dimension_semantics = [#tpu.dimension_semantics<parallel>], iteration_bounds = array<i64: 1>, scalar_prefetch = 0 : i64, scratch_operands = 0 : i64, tpu.core_type = #tpu.core_type<tc>, window_params = [{transform_indices = @transform_0, window_bounds = array<i64: 16, 32>}, {pipeline_mode = #tpu.pipeline_mode<synchronous>, transform_indices = @transform_1, window_bounds = array<i64: 32, 64>}, {pipeline_mode = #tpu.pipeline_mode<synchronous>, transform_indices = @transform_2, window_bounds = array<i64: 1, 64>}, {transform_indices = @transform_3, window_bounds = array<i64: 16, 64>}]} {
    %c0 = arith.constant 0 : index
    %c0_0 = arith.constant 0 : index
    %0 = vector.load %arg1[%c0, %c0_0] : memref<16x32xbf16, #tpu.memory_space<vmem>>, vector<16x32xbf16>
    %c0_1 = arith.constant 0 : index
    %c0_2 = arith.constant 0 : index
    %1 = vector.load %arg2[%c0_1, %c0_2] : memref<32x64xbf16, #tpu.memory_space<vmem>>, vector<32x64xbf16>
    %cst = arith.constant dense<0.000000e+00> : vector<16x64xf32>
    %2 = tpu.matmul %0, %1, %cst {dimension_numbers = #tpu.dot_dimension_numbers<[1], [0], [0], [1], [0, 0, 1, 1], [], []>} : vector<16x32xbf16>, vector<32x64xbf16>, vector<16x64xf32> -> vector<16x64xf32>
    %c0_3 = arith.constant 0 : index
    %c0_4 = arith.constant 0 : index
    %3 = vector.load %arg3[%c0_3, %c0_4] : memref<1x64xf32, #tpu.memory_space<vmem>>, vector<1x64xf32>
    %4 = vector.broadcast %3 : vector<1x64xf32> to vector<16x64xf32>
    %5 = arith.addf %2, %4 : vector<16x64xf32>
    %cst_5 = arith.constant 5.000000e-01 : f32
    %6 = vector.broadcast %cst_5 : f32 to vector<16x64xf32>
    %7 = arith.mulf %5, %6 : vector<16x64xf32>
    %cst_6 = arith.constant 0.707106769 : f32
    %8 = vector.broadcast %cst_6 : f32 to vector<16x64xf32>
    %9 = arith.mulf %5, %8 : vector<16x64xf32>
    %10 = math.erf %9 : vector<16x64xf32>
    %cst_7 = arith.constant 1.000000e+00 : f32
    %11 = vector.broadcast %cst_7 : f32 to vector<16x64xf32>
    %12 = arith.addf %11, %10 : vector<16x64xf32>
    %13 = arith.mulf %7, %12 : vector<16x64xf32>
    %14 = arith.truncf %13 : vector<16x64xf32> to vector<16x64xbf16>
    %c0_8 = arith.constant 0 : index
    %c0_9 = arith.constant 0 : index
    %15 = vector.load %arg4[%c0_8, %c0_9] : memref<16x64xbf16, #tpu.memory_space<vmem>>, vector<16x64xbf16>
    tpu.vector_store %arg4[%c0_8, %c0_9], %14 {strides = array<i32>} : memref<16x64xbf16, #tpu.memory_space<vmem>>, vector<16x64xbf16>,
    return
  }
  func.func @transform_0(%arg0: i32) -> (i32, i32) {
    %c0_i32 = arith.constant 0 : i32
    %c0_i32_0 = arith.constant 0 : i32
    return %arg0, %c0_i32 : i32, i32
  }
  func.func @transform_1(%arg0: i32) -> (i32, i32) {
    %c0_i32 = arith.constant 0 : i32
    %c0_i32_0 = arith.constant 0 : i32
    %c0_i32_1 = arith.constant 0 : i32
    return %c0_i32, %c0_i32_0 : i32, i32
  }
  func.func @transform_2(%arg0: i32) -> (i32, i32) {
    %c0_i32 = arith.constant 0 : i32
    %c0_i32_0 = arith.constant 0 : i32
    %c0_i32_1 = arith.constant 0 : i32
    return %c0_i32, %c0_i32_0 : i32, i32
  }
  func.func @transform_3(%arg0: i32) -> (i32, i32) {
    %c0_i32 = arith.constant 0 : i32
    %c0_i32_0 = arith.constant 0 : i32
    return %arg0, %c0_i32 : i32, i32
  }
}

module attributes {stable_mosaic.version = 11 : i64} {
  func.func @_linear_add_ln_kernel(%arg0: i32, %arg1: memref<16x64xbf16, #tpu.memory_space<vmem>>, %arg2: memref<64x32xbf16, #tpu.memory_space<vmem>>, %arg3: memref<1x32xf32, #tpu.memory_space<vmem>>, %arg4: memref<16x32xbf16, #tpu.memory_space<vmem>>, %arg5: memref<1x32xf32, #tpu.memory_space<vmem>>, %arg6: memref<1x32xf32, #tpu.memory_space<vmem>>, %arg7: memref<16x32xbf16, #tpu.memory_space<vmem>>) attributes {dimension_semantics = [#tpu.dimension_semantics<parallel>], iteration_bounds = array<i64: 1>, scalar_prefetch = 0 : i64, scratch_operands = 0 : i64, tpu.core_type = #tpu.core_type<tc>, window_params = [{transform_indices = @transform_0, window_bounds = array<i64: 16, 64>}, {pipeline_mode = #tpu.pipeline_mode<synchronous>, transform_indices = @transform_1, window_bounds = array<i64: 64, 32>}, {pipeline_mode = #tpu.pipeline_mode<synchronous>, transform_indices = @transform_2, window_bounds = array<i64: 1, 32>}, {transform_indices = @transform_3, window_bounds = array<i64: 16, 32>}, {pipeline_mode = #tpu.pipeline_mode<synchronous>, transform_indices = @transform_4, window_bounds = array<i64: 1, 32>}, {pipeline_mode = #tpu.pipeline_mode<synchronous>, transform_indices = @transform_5, window_bounds = array<i64: 1, 32>}, {transform_indices = @transform_6, window_bounds = array<i64: 16, 32>}]} {
    %c0 = arith.constant 0 : index
    %c0_0 = arith.constant 0 : index
    %0 = vector.load %arg1[%c0, %c0_0] : memref<16x64xbf16, #tpu.memory_space<vmem>>, vector<16x64xbf16>
    %c0_1 = arith.constant 0 : index
    %c0_2 = arith.constant 0 : index
    %1 = vector.load %arg2[%c0_1, %c0_2] : memref<64x32xbf16, #tpu.memory_space<vmem>>, vector<64x32xbf16>
    %cst = arith.constant dense<0.000000e+00> : vector<16x32xf32>
    %2 = tpu.matmul %0, %1, %cst {dimension_numbers = #tpu.dot_dimension_numbers<[1], [0], [0], [1], [0, 0, 1, 1], [], []>} : vector<16x64xbf16>, vector<64x32xbf16>, vector<16x32xf32> -> vector<16x32xf32>
    %c0_3 = arith.constant 0 : index
    %c0_4 = arith.constant 0 : index
    %3 = vector.load %arg3[%c0_3, %c0_4] : memref<1x32xf32, #tpu.memory_space<vmem>>, vector<1x32xf32>
    %4 = vector.broadcast %3 : vector<1x32xf32> to vector<16x32xf32>
    %5 = arith.addf %2, %4 : vector<16x32xf32>
    %c0_5 = arith.constant 0 : index
    %c0_6 = arith.constant 0 : index
    %6 = vector.load %arg4[%c0_5, %c0_6] : memref<16x32xbf16, #tpu.memory_space<vmem>>, vector<16x32xbf16>
    %7 = arith.extf %6 : vector<16x32xbf16> to vector<16x32xf32>
    %8 = arith.addf %5, %7 : vector<16x32xf32>
    %cst_7 = arith.constant dense<0.000000e+00> : vector<16xf32>
    %9 = vector.multi_reduction <add>, %8, %cst_7 [1] : vector<16x32xf32> to vector<16xf32>
    %10 = vector.shape_cast %9 : vector<16xf32> to vector<16x1xf32>
    %cst_8 = arith.constant 3.200000e+01 : f32
    %11 = vector.broadcast %cst_8 : f32 to vector<16x1xf32>
    %12 = arith.divf %10, %11 : vector<16x1xf32>
    %13 = vector.broadcast %12 : vector<16x1xf32> to vector<16x32xf32>
    %14 = arith.subf %8, %13 : vector<16x32xf32>
    %15 = arith.mulf %14, %14 : vector<16x32xf32>
    %cst_9 = arith.constant dense<0.000000e+00> : vector<16xf32>
    %16 = vector.multi_reduction <add>, %15, %cst_9 [1] : vector<16x32xf32> to vector<16xf32>
    %17 = vector.shape_cast %16 : vector<16xf32> to vector<16x1xf32>
    %cst_10 = arith.constant 3.200000e+01 : f32
    %18 = vector.broadcast %cst_10 : f32 to vector<16x1xf32>
    %19 = arith.divf %17, %18 : vector<16x1xf32>
    %20 = vector.broadcast %12 : vector<16x1xf32> to vector<16x32xf32>
    %21 = arith.subf %8, %20 : vector<16x32xf32>
    %cst_11 = arith.constant 9.99999996E-13 : f32
    %22 = vector.broadcast %cst_11 : f32 to vector<16x1xf32>
    %23 = arith.addf %19, %22 : vector<16x1xf32>
    %24 = math.rsqrt %23 : vector<16x1xf32>
    %25 = vector.broadcast %24 : vector<16x1xf32> to vector<16x32xf32>
    %26 = arith.mulf %21, %25 : vector<16x32xf32>
    %c0_12 = arith.constant 0 : index
    %c0_13 = arith.constant 0 : index
    %27 = vector.load %arg5[%c0_12, %c0_13] : memref<1x32xf32, #tpu.memory_space<vmem>>, vector<1x32xf32>
    %28 = vector.broadcast %27 : vector<1x32xf32> to vector<16x32xf32>
    %29 = arith.mulf %26, %28 : vector<16x32xf32>
    %c0_14 = arith.constant 0 : index
    %c0_15 = arith.constant 0 : index
    %30 = vector.load %arg6[%c0_14, %c0_15] : memref<1x32xf32, #tpu.memory_space<vmem>>, vector<1x32xf32>
    %31 = vector.broadcast %30 : vector<1x32xf32> to vector<16x32xf32>
    %32 = arith.addf %29, %31 : vector<16x32xf32>
    %33 = arith.truncf %32 : vector<16x32xf32> to vector<16x32xbf16>
    %c0_16 = arith.constant 0 : index
    %c0_17 = arith.constant 0 : index
    %34 = vector.load %arg7[%c0_16, %c0_17] : memref<16x32xbf16, #tpu.memory_space<vmem>>, vector<16x32xbf16>
    tpu.vector_store %arg7[%c0_16, %c0_17], %33 {strides = array<i32>} : memref<16x32xbf16, #tpu.memory_space<vmem>>, vector<16x32xbf16>,
    return
  }
  func.func @transform_0(%arg0: i32) -> (i32, i32) {
    %c0_i32 = arith.constant 0 : i32
    %c0_i32_0 = arith.constant 0 : i32
    return %arg0, %c0_i32 : i32, i32
  }
  func.func @transform_1(%arg0: i32) -> (i32, i32) {
    %c0_i32 = arith.constant 0 : i32
    %c0_i32_0 = arith.constant 0 : i32
    %c0_i32_1 = arith.constant 0 : i32
    return %c0_i32, %c0_i32_0 : i32, i32
  }
  func.func @transform_2(%arg0: i32) -> (i32, i32) {
    %c0_i32 = arith.constant 0 : i32
    %c0_i32_0 = arith.constant 0 : i32
    %c0_i32_1 = arith.constant 0 : i32
    return %c0_i32, %c0_i32_0 : i32, i32
  }
  func.func @transform_3(%arg0: i32) -> (i32, i32) {
    %c0_i32 = arith.constant 0 : i32
    %c0_i32_0 = arith.constant 0 : i32
    return %arg0, %c0_i32 : i32, i32
  }
  func.func @transform_4(%arg0: i32) -> (i32, i32) {
    %c0_i32 = arith.constant 0 : i32
    %c0_i32_0 = arith.constant 0 : i32
    %c0_i32_1 = arith.constant 0 : i32
    return %c0_i32, %c0_i32_0 : i32, i32
  }
  func.func @transform_5(%arg0: i32) -> (i32, i32) {
    %c0_i32 = arith.constant 0 : i32
    %c0_i32_0 = arith.constant 0 : i32
    %c0_i32_1 = arith.constant 0 : i32
    return %c0_i32, %c0_i32_0 : i32, i32
  }
  func.func @transform_6(%arg0: i32) -> (i32, i32) {
    %c0_i32 = arith.constant 0 : i32
    %c0_i32_0 = arith.constant 0 : i32
    return %arg0, %c0_i32 : i32, i32
  }
}

module attributes {stable_mosaic.version = 11 : i64} {
  func.func @_linear_kernel(%arg0: i32, %arg1: memref<8x32xbf16, #tpu.memory_space<vmem>>, %arg2: memref<32x32xbf16, #tpu.memory_space<vmem>>, %arg3: memref<1x32xf32, #tpu.memory_space<vmem>>, %arg4: memref<8x32xbf16, #tpu.memory_space<vmem>>) attributes {dimension_semantics = [#tpu.dimension_semantics<parallel>], iteration_bounds = array<i64: 1>, scalar_prefetch = 0 : i64, scratch_operands = 0 : i64, tpu.core_type = #tpu.core_type<tc>, window_params = [{transform_indices = @transform_0, window_bounds = array<i64: 8, 32>}, {pipeline_mode = #tpu.pipeline_mode<synchronous>, transform_indices = @transform_1, window_bounds = array<i64: 32, 32>}, {pipeline_mode = #tpu.pipeline_mode<synchronous>, transform_indices = @transform_2, window_bounds = array<i64: 1, 32>}, {transform_indices = @transform_3, window_bounds = array<i64: 8, 32>}]} {
    %c0 = arith.constant 0 : index
    %c0_0 = arith.constant 0 : index
    %0 = vector.load %arg1[%c0, %c0_0] : memref<8x32xbf16, #tpu.memory_space<vmem>>, vector<8x32xbf16>
    %c0_1 = arith.constant 0 : index
    %c0_2 = arith.constant 0 : index
    %1 = vector.load %arg2[%c0_1, %c0_2] : memref<32x32xbf16, #tpu.memory_space<vmem>>, vector<32x32xbf16>
    %cst = arith.constant dense<0.000000e+00> : vector<8x32xf32>
    %2 = tpu.matmul %0, %1, %cst {dimension_numbers = #tpu.dot_dimension_numbers<[1], [0], [0], [1], [0, 0, 1, 1], [], []>} : vector<8x32xbf16>, vector<32x32xbf16>, vector<8x32xf32> -> vector<8x32xf32>
    %c0_3 = arith.constant 0 : index
    %c0_4 = arith.constant 0 : index
    %3 = vector.load %arg3[%c0_3, %c0_4] : memref<1x32xf32, #tpu.memory_space<vmem>>, vector<1x32xf32>
    %4 = vector.broadcast %3 : vector<1x32xf32> to vector<8x32xf32>
    %5 = arith.addf %2, %4 : vector<8x32xf32>
    %cst_5 = arith.constant 5.000000e-01 : f32
    %6 = vector.broadcast %cst_5 : f32 to vector<8x32xf32>
    %7 = arith.mulf %5, %6 : vector<8x32xf32>
    %cst_6 = arith.constant 0.707106769 : f32
    %8 = vector.broadcast %cst_6 : f32 to vector<8x32xf32>
    %9 = arith.mulf %5, %8 : vector<8x32xf32>
    %10 = math.erf %9 : vector<8x32xf32>
    %cst_7 = arith.constant 1.000000e+00 : f32
    %11 = vector.broadcast %cst_7 : f32 to vector<8x32xf32>
    %12 = arith.addf %11, %10 : vector<8x32xf32>
    %13 = arith.mulf %7, %12 : vector<8x32xf32>
    %14 = arith.truncf %13 : vector<8x32xf32> to vector<8x32xbf16>
    %c0_8 = arith.constant 0 : index
    %c0_9 = arith.constant 0 : index
    %15 = vector.load %arg4[%c0_8, %c0_9] : memref<8x32xbf16, #tpu.memory_space<vmem>>, vector<8x32xbf16>
    tpu.vector_store %arg4[%c0_8, %c0_9], %14 {strides = array<i32>} : memref<8x32xbf16, #tpu.memory_space<vmem>>, vector<8x32xbf16>,
    return
  }
  func.func @transform_0(%arg0: i32) -> (i32, i32) {
    %c0_i32 = arith.constant 0 : i32
    %c0_i32_0 = arith.constant 0 : i32
    return %arg0, %c0_i32 : i32, i32
  }
  func.func @transform_1(%arg0: i32) -> (i32, i32) {
    %c0_i32 = arith.constant 0 : i32
    %c0_i32_0 = arith.constant 0 : i32
    %c0_i32_1 = arith.constant 0 : i32
    return %c0_i32, %c0_i32_0 : i32, i32
  }
  func.func @transform_2(%arg0: i32) -> (i32, i32) {
    %c0_i32 = arith.constant 0 : i32
    %c0_i32_0 = arith.constant 0 : i32
    %c0_i32_1 = arith.constant 0 : i32
    return %c0_i32, %c0_i32_0 : i32, i32
  }
  func.func @transform_3(%arg0: i32) -> (i32, i32) {
    %c0_i32 = arith.constant 0 : i32
    %c0_i32_0 = arith.constant 0 : i32
    return %arg0, %c0_i32 : i32, i32
  }
}

module attributes {stable_mosaic.version = 11 : i64} {
  func.func @_layernorm_kernel(%arg0: i32, %arg1: memref<8x32xbf16, #tpu.memory_space<vmem>>, %arg2: memref<1x32xf32, #tpu.memory_space<vmem>>, %arg3: memref<1x32xf32, #tpu.memory_space<vmem>>, %arg4: memref<8x32xbf16, #tpu.memory_space<vmem>>) attributes {dimension_semantics = [#tpu.dimension_semantics<parallel>], iteration_bounds = array<i64: 1>, scalar_prefetch = 0 : i64, scratch_operands = 0 : i64, tpu.core_type = #tpu.core_type<tc>, window_params = [{transform_indices = @transform_0, window_bounds = array<i64: 8, 32>}, {pipeline_mode = #tpu.pipeline_mode<synchronous>, transform_indices = @transform_1, window_bounds = array<i64: 1, 32>}, {pipeline_mode = #tpu.pipeline_mode<synchronous>, transform_indices = @transform_2, window_bounds = array<i64: 1, 32>}, {transform_indices = @transform_3, window_bounds = array<i64: 8, 32>}]} {
    %c0 = arith.constant 0 : index
    %c0_0 = arith.constant 0 : index
    %0 = vector.load %arg1[%c0, %c0_0] : memref<8x32xbf16, #tpu.memory_space<vmem>>, vector<8x32xbf16>
    %1 = arith.extf %0 : vector<8x32xbf16> to vector<8x32xf32>
    %cst = arith.constant dense<0.000000e+00> : vector<8xf32>
    %2 = vector.multi_reduction <add>, %1, %cst [1] : vector<8x32xf32> to vector<8xf32>
    %3 = vector.shape_cast %2 : vector<8xf32> to vector<8x1xf32>
    %cst_1 = arith.constant 3.200000e+01 : f32
    %4 = vector.broadcast %cst_1 : f32 to vector<8x1xf32>
    %5 = arith.divf %3, %4 : vector<8x1xf32>
    %6 = vector.broadcast %5 : vector<8x1xf32> to vector<8x32xf32>
    %7 = arith.subf %1, %6 : vector<8x32xf32>
    %8 = arith.mulf %7, %7 : vector<8x32xf32>
    %cst_2 = arith.constant dense<0.000000e+00> : vector<8xf32>
    %9 = vector.multi_reduction <add>, %8, %cst_2 [1] : vector<8x32xf32> to vector<8xf32>
    %10 = vector.shape_cast %9 : vector<8xf32> to vector<8x1xf32>
    %cst_3 = arith.constant 3.200000e+01 : f32
    %11 = vector.broadcast %cst_3 : f32 to vector<8x1xf32>
    %12 = arith.divf %10, %11 : vector<8x1xf32>
    %13 = vector.broadcast %5 : vector<8x1xf32> to vector<8x32xf32>
    %14 = arith.subf %1, %13 : vector<8x32xf32>
    %cst_4 = arith.constant 9.99999996E-13 : f32
    %15 = vector.broadcast %cst_4 : f32 to vector<8x1xf32>
    %16 = arith.addf %12, %15 : vector<8x1xf32>
    %17 = math.rsqrt %16 : vector<8x1xf32>
    %18 = vector.broadcast %17 : vector<8x1xf32> to vector<8x32xf32>
    %19 = arith.mulf %14, %18 : vector<8x32xf32>
    %c0_5 = arith.constant 0 : index
    %c0_6 = arith.constant 0 : index
    %20 = vector.load %arg2[%c0_5, %c0_6] : memref<1x32xf32, #tpu.memory_space<vmem>>, vector<1x32xf32>
    %21 = vector.broadcast %20 : vector<1x32xf32> to vector<8x32xf32>
    %22 = arith.mulf %19, %21 : vector<8x32xf32>
    %c0_7 = arith.constant 0 : index
    %c0_8 = arith.constant 0 : index
    %23 = vector.load %arg3[%c0_7, %c0_8] : memref<1x32xf32, #tpu.memory_space<vmem>>, vector<1x32xf32>
    %24 = vector.broadcast %23 : vector<1x32xf32> to vector<8x32xf32>
    %25 = arith.addf %22, %24 : vector<8x32xf32>
    %26 = arith.truncf %25 : vector<8x32xf32> to vector<8x32xbf16>
    %c0_9 = arith.constant 0 : index
    %c0_10 = arith.constant 0 : index
    %27 = vector.load %arg4[%c0_9, %c0_10] : memref<8x32xbf16, #tpu.memory_space<vmem>>, vector<8x32xbf16>
    tpu.vector_store %arg4[%c0_9, %c0_10], %26 {strides = array<i32>} : memref<8x32xbf16, #tpu.memory_space<vmem>>, vector<8x32xbf16>,
    return
  }
  func.func @transform_0(%arg0: i32) -> (i32, i32) {
    %c0_i32 = arith.constant 0 : i32
    %c0_i32_0 = arith.constant 0 : i32
    return %arg0, %c0_i32 : i32, i32
  }
  func.func @transform_1(%arg0: i32) -> (i32, i32) {
    %c0_i32 = arith.constant 0 : i32
    %c0_i32_0 = arith.constant 0 : i32
    %c0_i32_1 = arith.constant 0 : i32
    return %c0_i32, %c0_i32_0 : i32, i32
  }
  func.func @transform_2(%arg0: i32) -> (i32, i32) {
    %c0_i32 = arith.constant 0 : i32
    %c0_i32_0 = arith.constant 0 : i32
    %c0_i32_1 = arith.constant 0 : i32
    return %c0_i32, %c0_i32_0 : i32, i32
  }
  func.func @transform_3(%arg0: i32) -> (i32, i32) {
    %c0_i32 = arith.constant 0 : i32
    %c0_i32_0 = arith.constant 0 : i32
    return %arg0, %c0_i32 : i32, i32
  }
}

module attributes {stable_mosaic.version = 11 : i64} {
  func.func @_linear_t_kernel(%arg0: i32, %arg1: memref<8x32xbf16, #tpu.memory_space<vmem>>, %arg2: memref<128x32xbf16, #tpu.memory_space<vmem>>, %arg3: memref<1x128xf32, #tpu.memory_space<vmem>>, %arg4: memref<8x128xf32, #tpu.memory_space<vmem>>) attributes {dimension_semantics = [#tpu.dimension_semantics<parallel>], iteration_bounds = array<i64: 1>, scalar_prefetch = 0 : i64, scratch_operands = 0 : i64, tpu.core_type = #tpu.core_type<tc>, window_params = [{pipeline_mode = #tpu.pipeline_mode<synchronous>, transform_indices = @transform_0, window_bounds = array<i64: 8, 32>}, {transform_indices = @transform_1, window_bounds = array<i64: 128, 32>}, {transform_indices = @transform_2, window_bounds = array<i64: 1, 128>}, {transform_indices = @transform_3, window_bounds = array<i64: 8, 128>}]} {
    %c0 = arith.constant 0 : index
    %c0_0 = arith.constant 0 : index
    %0 = vector.load %arg1[%c0, %c0_0] : memref<8x32xbf16, #tpu.memory_space<vmem>>, vector<8x32xbf16>
    %c0_1 = arith.constant 0 : index
    %c0_2 = arith.constant 0 : index
    %1 = vector.load %arg2[%c0_1, %c0_2] : memref<128x32xbf16, #tpu.memory_space<vmem>>, vector<128x32xbf16>
    %cst = arith.constant dense<0.000000e+00> : vector<8x128xf32>
    %2 = tpu.matmul %0, %1, %cst {dimension_numbers = #tpu.dot_dimension_numbers<[1], [1], [0], [0], [0, 0, 1, 0], [], []>} : vector<8x32xbf16>, vector<128x32xbf16>, vector<8x128xf32> -> vector<8x128xf32>
    %c0_3 = arith.constant 0 : index
    %c0_4 = arith.constant 0 : index
    %3 = vector.load %arg3[%c0_3, %c0_4] : memref<1x128xf32, #tpu.memory_space<vmem>>, vector<1x128xf32>
    %4 = vector.broadcast %3 : vector<1x128xf32> to vector<8x128xf32>
    %5 = arith.addf %2, %4 : vector<8x128xf32>
    %c0_5 = arith.constant 0 : index
    %c0_6 = arith.constant 0 : index
    %6 = vector.load %arg4[%c0_5, %c0_6] : memref<8x128xf32, #tpu.memory_space<vmem>>, vector<8x128xf32>
    tpu.vector_store %arg4[%c0_5, %c0_6], %5 {strides = array<i32>} : memref<8x128xf32, #tpu.memory_space<vmem>>, vector<8x128xf32>,
    return
  }
  func.func @transform_0(%arg0: i32) -> (i32, i32) {
    %c0_i32 = arith.constant 0 : i32
    %c0_i32_0 = arith.constant 0 : i32
    %c0_i32_1 = arith.constant 0 : i32
    return %c0_i32, %c0_i32_0 : i32, i32
  }
  func.func @transform_1(%arg0: i32) -> (i32, i32) {
    %c0_i32 = arith.constant 0 : i32
    %c0_i32_0 = arith.constant 0 : i32
    return %arg0, %c0_i32 : i32, i32
  }
  func.func @transform_2(%arg0: i32) -> (i32, i32) {
    %c0_i32 = arith.constant 0 : i32
    %c0_i32_0 = arith.constant 0 : i32
    return %c0_i32, %arg0 : i32, i32
  }
  func.func @transform_3(%arg0: i32) -> (i32, i32) {
    %c0_i32 = arith.constant 0 : i32
    %c0_i32_0 = arith.constant 0 : i32
    return %c0_i32, %arg0 : i32, i32
  }
}

module attributes {stable_mosaic.version = 11 : i64} {
  func.func @_linear_kernel(%arg0: i32, %arg1: memref<2x32xbf16, #tpu.memory_space<vmem>>, %arg2: memref<32x32xbf16, #tpu.memory_space<vmem>>, %arg3: memref<1x32xf32, #tpu.memory_space<vmem>>, %arg4: memref<2x32xbf16, #tpu.memory_space<vmem>>) attributes {dimension_semantics = [#tpu.dimension_semantics<parallel>], iteration_bounds = array<i64: 1>, scalar_prefetch = 0 : i64, scratch_operands = 0 : i64, tpu.core_type = #tpu.core_type<tc>, window_params = [{transform_indices = @transform_0, window_bounds = array<i64: 2, 32>}, {pipeline_mode = #tpu.pipeline_mode<synchronous>, transform_indices = @transform_1, window_bounds = array<i64: 32, 32>}, {pipeline_mode = #tpu.pipeline_mode<synchronous>, transform_indices = @transform_2, window_bounds = array<i64: 1, 32>}, {transform_indices = @transform_3, window_bounds = array<i64: 2, 32>}]} {
    %c0 = arith.constant 0 : index
    %c0_0 = arith.constant 0 : index
    %0 = vector.load %arg1[%c0, %c0_0] : memref<2x32xbf16, #tpu.memory_space<vmem>>, vector<2x32xbf16>
    %c0_1 = arith.constant 0 : index
    %c0_2 = arith.constant 0 : index
    %1 = vector.load %arg2[%c0_1, %c0_2] : memref<32x32xbf16, #tpu.memory_space<vmem>>, vector<32x32xbf16>
    %cst = arith.constant dense<0.000000e+00> : vector<2x32xf32>
    %2 = tpu.matmul %0, %1, %cst {dimension_numbers = #tpu.dot_dimension_numbers<[1], [0], [0], [1], [0, 0, 1, 1], [], []>} : vector<2x32xbf16>, vector<32x32xbf16>, vector<2x32xf32> -> vector<2x32xf32>
    %c0_3 = arith.constant 0 : index
    %c0_4 = arith.constant 0 : index
    %3 = vector.load %arg3[%c0_3, %c0_4] : memref<1x32xf32, #tpu.memory_space<vmem>>, vector<1x32xf32>
    %4 = vector.broadcast %3 : vector<1x32xf32> to vector<2x32xf32>
    %5 = arith.addf %2, %4 : vector<2x32xf32>
    %6 = math.tanh %5 : vector<2x32xf32>
    %7 = arith.truncf %6 : vector<2x32xf32> to vector<2x32xbf16>
    %c0_5 = arith.constant 0 : index
    %c0_6 = arith.constant 0 : index
    %8 = vector.load %arg4[%c0_5, %c0_6] : memref<2x32xbf16, #tpu.memory_space<vmem>>, vector<2x32xbf16>
    tpu.vector_store %arg4[%c0_5, %c0_6], %7 {strides = array<i32>} : memref<2x32xbf16, #tpu.memory_space<vmem>>, vector<2x32xbf16>,
    return
  }
  func.func @transform_0(%arg0: i32) -> (i32, i32) {
    %c0_i32 = arith.constant 0 : i32
    %c0_i32_0 = arith.constant 0 : i32
    return %arg0, %c0_i32 : i32, i32
  }
  func.func @transform_1(%arg0: i32) -> (i32, i32) {
    %c0_i32 = arith.constant 0 : i32
    %c0_i32_0 = arith.constant 0 : i32
    %c0_i32_1 = arith.constant 0 : i32
    return %c0_i32, %c0_i32_0 : i32, i32
  }
  func.func @transform_2(%arg0: i32) -> (i32, i32) {
    %c0_i32 = arith.constant 0 : i32
    %c0_i32_0 = arith.constant 0 : i32
    %c0_i32_1 = arith.constant 0 : i32
    return %c0_i32, %c0_i32_0 : i32, i32
  }
  func.func @transform_3(%arg0: i32) -> (i32, i32) {
    %c0_i32 = arith.constant 0 : i32
    %c0_i32_0 = arith.constant 0 : i32
    return %arg0, %c0_i32 : i32, i32
  }
}

module attributes {stable_mosaic.version = 11 : i64} {
  func.func @_linear_kernel(%arg0: i32, %arg1: memref<2x32xbf16, #tpu.memory_space<vmem>>, %arg2: memref<32x2xbf16, #tpu.memory_space<vmem>>, %arg3: memref<1x2xf32, #tpu.memory_space<vmem>>, %arg4: memref<2x2xf32, #tpu.memory_space<vmem>>) attributes {dimension_semantics = [#tpu.dimension_semantics<parallel>], iteration_bounds = array<i64: 1>, scalar_prefetch = 0 : i64, scratch_operands = 0 : i64, tpu.core_type = #tpu.core_type<tc>, window_params = [{transform_indices = @transform_0, window_bounds = array<i64: 2, 32>}, {pipeline_mode = #tpu.pipeline_mode<synchronous>, transform_indices = @transform_1, window_bounds = array<i64: 32, 2>}, {pipeline_mode = #tpu.pipeline_mode<synchronous>, transform_indices = @transform_2, window_bounds = array<i64: 1, 2>}, {transform_indices = @transform_3, window_bounds = array<i64: 2, 2>}]} {
    %c0 = arith.constant 0 : index
    %c0_0 = arith.constant 0 : index
    %0 = vector.load %arg1[%c0, %c0_0] : memref<2x32xbf16, #tpu.memory_space<vmem>>, vector<2x32xbf16>
    %c0_1 = arith.constant 0 : index
    %c0_2 = arith.constant 0 : index
    %1 = vector.load %arg2[%c0_1, %c0_2] : memref<32x2xbf16, #tpu.memory_space<vmem>>, vector<32x2xbf16>
    %cst = arith.constant dense<0.000000e+00> : vector<2x2xf32>
    %2 = tpu.matmul %0, %1, %cst {dimension_numbers = #tpu.dot_dimension_numbers<[1], [0], [0], [1], [0, 0, 1, 1], [], []>} : vector<2x32xbf16>, vector<32x2xbf16>, vector<2x2xf32> -> vector<2x2xf32>
    %c0_3 = arith.constant 0 : index
    %c0_4 = arith.constant 0 : index
    %3 = vector.load %arg3[%c0_3, %c0_4] : memref<1x2xf32, #tpu.memory_space<vmem>>, vector<1x2xf32>
    %4 = vector.broadcast %3 : vector<1x2xf32> to vector<2x2xf32>
    %5 = arith.addf %2, %4 : vector<2x2xf32>
    %c0_5 = arith.constant 0 : index
    %c0_6 = arith.constant 0 : index
    %6 = vector.load %arg4[%c0_5, %c0_6] : memref<2x2xf32, #tpu.memory_space<vmem>>, vector<2x2xf32>
    tpu.vector_store %arg4[%c0_5, %c0_6], %5 {strides = array<i32>} : memref<2x2xf32, #tpu.memory_space<vmem>>, vector<2x2xf32>,
    return
  }
  func.func @transform_0(%arg0: i32) -> (i32, i32) {
    %c0_i32 = arith.constant 0 : i32
    %c0_i32_0 = arith.constant 0 : i32
    return %arg0, %c0_i32 : i32, i32
  }
  func.func @transform_1(%arg0: i32) -> (i32, i32) {
    %c0_i32 = arith.constant 0 : i32
    %c0_i32_0 = arith.constant 0 : i32
    %c0_i32_1 = arith.constant 0 : i32
    return %c0_i32, %c0_i32_0 : i32, i32
  }
  func.func @transform_2(%arg0: i32) -> (i32, i32) {
    %c0_i32 = arith.constant 0 : i32
    %c0_i32_0 = arith.constant 0 : i32
    %c0_i32_1 = arith.constant 0 : i32
    return %c0_i32, %c0_i32_0 : i32, i32
  }
  func.func @transform_3(%arg0: i32) -> (i32, i32) {
    %c0_i32 = arith.constant 0 : i32
    %c0_i32_0 = arith.constant 0 : i32
    return %arg0, %c0_i32 : i32, i32
  }
}

</mosaic_0001>

<bundles_post_ra>
// kernel: bert_pretrain_forward.16
= control target key start
LH: loop header
LB: loop body
LE: loop exit
PB: predicated region body
PF: predicated region fallthrough
CT: control target
= control target key end

     0   :  { %s547_s18 = smov 0   ;;  %s549_s19 = smov 0   ;;  %s602_s0 = inlined_call_operand.vmem [shape: bf16[2,8,32], index: 0, kind: input, shape index: {}]   ;;  %s603_s1 = inlined_call_operand.vmem [shape: f32[8,32], index: 1, kind: input, shape index: {}]   ;;  %s604_s2 = inlined_call_operand.vmem [shape: f32[2,8,32], index: 2, kind: input, shape index: {}]   ;;  %s605_s3 = inlined_call_operand.vmem [shape: f32[1,32], index: 3, kind: input, shape index: {}]   ;;  %s606_s4 = inlined_call_operand.vmem [shape: f32[1,32], index: 4, kind: input, shape index: {}]   ;;  %s607_s5 = inlined_call_operand.vmem [shape: bf16[2,8,32], index: 5, kind: output, shape index: {}]  }
   0x1   :  { %s551_s20 = smov 0  }
   0x2 LB: > { %s27_s21 = sadd.s32 1, %s510_s19  ;;  %p455_p0 = scmp.ge.s32.totalorder %s514_s20, 1  ;;  %s514_s20 = sphi %s551_s20, %s15_s20   ;;  %s510_s19 = sphi %s549_s19, %s609_s19   ;;  %s506_s18 = sphi %s547_s18, %s608_s18  }
   0x3   : > { %p29_p1 = scmp.ge.s32.totalorder %s27_s21, 2  ;;  %p228_p2 = scmp.lt.s32.totalorder %s514_s20, 3 }
   0x5   : > { %s611_s21 = smov (%p29_p1, %s27_s21), 0  ;;  %p229_p3 = pnand %p455_p0, %p228_p2 }
   0x6   : > { %p271_p4 = scmp.lt.s32.totalorder (!%p229_p3), %s506_s18, 1 }
   0x7   : > { %232 = sbr.rel (%p229_p3) target bundleno = 293 (0x125), region = 40 }
   0xc   : > { %s613_s18 = smov (!%p271_p4, %s506_s18), 1  ;;  %v298_v1 = vld [vmem:[%s603_s1] sm:$0xff]  ;;  %vm302_vm0 = vcmask 261120   ;;  %v516_v7 = vmov 32.0   ;;  %vm343_vm5 = vcmask 257024  }
   0xd   : > { %s456_s22 = sshll.u32 %s613_s18, 2  ;;  %s457_s23 = sshll.u32 %s613_s18, 3  ;;  %488 = vrcp.f32 %v516_v7  ;;  %v486_v28 = vld [vmem:[%s605_s3] ss:$0 sm:$0xff] }
   0xe   : > { %s277_s26 = scalar_lea.vmem %s602_s0, %s456_s22  ;;  %s288_s29 = scalar_lea.vmem %s604_s2, %s457_s23  ;;  %v487_v30 = vld [vmem:[%s606_s4] ss:$0 sm:$0xff] }
   0xf   : > { %v296_v0 = vld [vmem:[%s277_s26] sm:$0xf]  ;;  %s295_s13 = scalar_lea.vmem %s607_s5, %s456_s22 }
  0x10   : > { %v297_v2 = vunpack.c.l.bf16 %v296_v0  ;;  %v300_v3 = vld [vmem:[%s288_s29] sm:$0xff] }
  0x12   : > { %v299_v4 = vadd.f32 %v298_v1, %v297_v2 }
  0x13   : > { %v489_v8 = vpop.eup %488 }
  0x14   : > { %v301_v5 = vadd.f32 %v300_v3, %v299_v4  ;;  %v307_v9 = vmul.f32 32.0, %v489_v8  ;;  %vm311_vm1 = vweird.f32 %v489_v8 }
  0x16   : > { %v303_v6 = vsel %vm302_vm0, %v301_v5, 0.0  ;;  %v308_v10 = vsub.f32 1.0, %v307_v9 }
  0x17   : > { %304 = vadd.xlane.f32.xlu0 %v303_v6 }
  0x18   : > { %v309_v11 = vmul.f32 %v489_v8, %v308_v10 }
  0x1a   : > { %v310_v12 = vadd.f32 %v489_v8, %v309_v11 }
  0x1c   : > { %v312_v13 = vsel %vm311_vm1, %v489_v8, %v310_v12 }
  0x8a   : > { %v305_v14 = vpop.xlane.xlu0 %304 }
  0x8b   : > { %v313_v15 = vmul.f32 %v312_v13, %v305_v14 }
  0x8d   : > { %v314_v16 = vsub.f32 %v301_v5, %v313_v15 }
  0x8f   : > { %v315_v17 = vmul.f32 %v314_v16, %v314_v16 }
  0x91   : > { %v316_v18 = vsel %vm302_vm0, %v315_v17, 0.0 }
  0x92   : > { %317 = vadd.xlane.f32.xlu0 %v316_v18 }
 0x105   : > { %v318_v19 = vpop.xlane.xlu0 %317 }
 0x106   : > { %v319_v20 = vmul.f32 %v318_v19, %v312_v13 }
 0x108   : > { %v320_v21 = vadd.f32 1e-12, %v319_v20 }
 0x10a   : > { %490 = vrsqrt.f32 %v320_v21  ;;  %vm327_vm3 = vweird.f32 %v320_v21 }
 0x110   : > { %v491_v22 = vpop.eup %490 }
 0x111   : > { %v322_v23 = vmul.f32 %v491_v22, %v320_v21  ;;  %vm328_vm2 = vweird.f32 %v491_v22 }
 0x112   : > { %vm329_vm4 = vmor %vm327_vm3, %vm328_vm2 }
 0x113   : > { %v323_v24 = vmul.f32 %v491_v22, %v322_v23 }
 0x115   : > { %v324_v25 = vmul.f32 0.5, %v323_v24 }
 0x117   : > { %v325_v26 = vsub.f32 1.5, %v324_v25 }
 0x119   : > { %v326_v27 = vmul.f32 %v491_v22, %v325_v26 }
 0x11b   : > { %v330_v29 = vsel %vm329_vm4, %v491_v22, %v326_v27 }
 0x11c   : > { %v331_v31 = vmul.f32 %v330_v29, %v314_v16 }
 0x11e   : > { %v336_v32 = vmul.f32 %v486_v28, %v331_v31 }
 0x120   : > { %v341_v33 = vadd.f32 %v487_v30, %v336_v32 }
 0x122   : > { %v342_v34 = vpack.c.bf16 %v341_v33, %v341_v33 }
 0x124   : > { %344 = vst.msk [vmem:[%s295_s13] sm:$0xf] %vm343_vm5, %v342_v34 }
 0x125 PF: > { %s15_s20 = sadd.s32 1, %s514_s20   ;;  %s608_s18 = smov %s510_s19 }
 0x126   : > { %p12_p5 = scmp.ge.s32.totalorder %s15_s20, 4   ;;  %s609_s19 = smov %s611_s21 }
 0x128   :  { %14 = sbr.rel (!%p12_p5) target bundleno = 2 (0x2), region = 76 }

// kernel: bert_pretrain_forward.17
= control target key start
LH: loop header
LB: loop body
LE: loop exit
PB: predicated region body
PF: predicated region fallthrough
CT: control target
= control target key end

     0   :  { %vm42_vm0 = vcmask 261120   ;;  %vm62_vm1 = vcmask 781312   ;;  %s124_s1 = inlined_call_operand.vmem [shape: bf16[32,96], index: 1, kind: input, shape index: {}]   ;;  %s125_s2 = inlined_call_operand.vmem [shape: f32[1,96], index: 2, kind: input, shape index: {}]   ;;  %s126_s0 = inlined_call_operand.vmem [shape: bf16[16,32], index: 0, kind: input, shape index: {}]   ;;  %s127_s3 = inlined_call_operand.vmem [shape: bf16[16,96], index: 3, kind: output, shape index: {}]  }
   0x1   :  { %v84_v0 = vld [vmem:[%s124_s1 + $0x8] sm:$0xff]  ;;  %v83_v1 = vld [vmem:[%s124_s1] sm:$0xff] }
   0x2   :  { %52 = vmatpush.bf16.msra.mxu0 %v84_v0  ;;  %v82_v2 = vld [vmem:[%s126_s0] sm:$0xff] }
   0x3   :  { %v85_v3 = vld [vmem:[%s125_s2] ss:$0 sm:$0xff] }
   0x6   :  { %53 = vmatpush.bf16.msra.mxu0 %v83_v1 }
   0x9   :  { %81 = vmatmul.msk.bf16.vlgmr.msra.gmra.mxu0 %vm42_vm0, %v82_v2 }
  0x86   :  { %v55_v4 = vpop.f32.mrf.mxu0 }
  0x87   :  { %v56_v5 = vadd.f32 %v85_v3, %v55_v4 }
  0x89   :  { %v60_v6 = vpack.c.bf16 %v56_v5, %v56_v5 }
  0x8b   :  { %63 = vst.msk [vmem:[%s127_s3] sm:$0xf] %vm62_vm1, %v60_v6 }
  0x8e   :  { %v57_v7 = vpop.f32.mrf.mxu0 }
  0x8f   :  { %v58_v8 = vadd.f32 %v85_v3, %v57_v7 }
  0x91   :  { %v61_v9 = vpack.c.bf16 %v58_v8, %v58_v8 }
  0x93   :  { %64 = vst.msk [vmem:[%s127_s3 + $0x4] sm:$0xf] %vm62_vm1, %v61_v9 }

// kernel: bert_pretrain_forward.18
= control target key start
LH: loop header
LB: loop body
LE: loop exit
PB: predicated region body
PF: predicated region fallthrough
CT: control target
= control target key end

     0   :  { %s563_s9 = smov 0   ;;  %s633_s0 = inlined_call_operand.vmem [shape: bf16[2,8,96], index: 0, kind: input, shape index: {}]   ;;  %s634_s1 = inlined_call_operand.vmem [shape: f32[2,1,8], index: 1, kind: input, shape index: {}]   ;;  %s635_s2 = inlined_call_operand.vmem [shape: bf16[2,8,32], index: 2, kind: output, shape index: {}]  }
   0x1 LB: > { %s472_s10 = sadd.s32 4294967295, %s533_s9   ;;  %p476_p0 = scmp.ge.s32.totalorder %s533_s9, 1  ;;  %s533_s9 = sphi %s563_s9, %s12_s9  }
   0x2   : > { %p119_p1 = scmp.lt.s32.totalorder %s533_s9, 3 }
   0x4   : > { %p120_p2 = pnand %p476_p0, %p119_p1 }
   0x5   : > { %p142_p3 = scmp.lt.s32.totalorder (!%p120_p2), %s472_s10, 1  ;;  %s535_s15 = smov (!%p120_p2), 96  }
   0x6   : > { %123 = sbr.rel (%p120_p2) target bundleno = 1153 (0x481), region = 28  ;;  %s536_s16 = smov (!%p120_p2), 72  }
   0x7   : > { %s537_s17 = smov (!%p120_p2), 88   ;;  %s538_s18 = smov (!%p120_p2), 104  }
   0x8   : > { %s539_s22 = smov (!%p120_p2), 120   ;;  %s540_s23 = smov (!%p120_p2), 64  }
   0x9   : > { %s541_s24 = smov (!%p120_p2), 80   ;;  %s542_s25 = smov (!%p120_p2), 112  }
   0xa   : > { %s543_s26 = smov (!%p120_p2), 56   ;;  %s544_s27 = smov (!%p120_p2), 48  }
   0xb   : > { %s637_s10 = smov (!%p142_p3, %s472_s10), 1  ;;  %vm167_vm0 = vcmask 64512   ;;  %vm204_vm1 = vcmask 1043456   ;;  %s545_s28 = smov 40   ;;  %vm284_vm2 = vcmask 125952   ;;  %vm408_vm3 = vcmask 257152  }
   0xc   : > { %s477_s11 = sshll.u32 %s637_s10, 2  ;;  %s148_s21 = scalar_lea.vmem %s634_s1, %s637_s10 }
   0xd   : > { %s145_s14 = scalar_lea.vmem %s633_s0, %s477_s11  ;;  %v596_v14 = vld [vmem:[%s148_s21] ss:$0 sm:$0xff]  ;;  %s546_s29 = smov 8  }
   0xe   : > { %v154_v0 = vld [vmem:[%s145_s14] sm:$0xf]  ;;  %s152_s4 = scalar_lea.vmem %s635_s2, %s477_s11  ;;  %s547_s5 = smov 16  }
   0xf   : > { %v163_v1 = vunpack.c.l.b16 %v154_v0  ;;  %v156_v2 = vunpack.c.l.bf16 %v154_v0 }
  0x11   : > { %v579_v3 = vpack.c.b16 %v163_v1, %v163_v1  ;;  %v157_v4 = vmul.f32 0.35351563, %v156_v2 }
  0x13   : > { %165 = vrot.lane.b32.xlu0 %v579_v3, %s535_s15  ;;  %344 = vrot.lane.b32.xlu1 %v579_v3, %s536_s16  ;;  %v158_v5 = vpack.c.bf16 %v157_v4, %v157_v4 }
  0x14   : > { %224 = vrot.lane.b32.xlu2 %v579_v3, %s537_s17 }
  0x1b   : > { %342 = vrot.lane.b32.xlu1 %v158_v5, %s538_s18 }
  0x23   : > { %222 = vrot.lane.b32.xlu1 %v158_v5, %s539_s22 }
  0x2b   : > { %199 = vrot.lane.b32.xlu1 %v579_v3, %s540_s23 }
  0x33   : > { %288 = vrot.lane.b32.xlu1 %v579_v3, %s541_s24 }
  0x3b   : > { %286 = vrot.lane.b32.xlu1 %v158_v5, %s542_s25 }
  0x6e   : > { %v225_v6 = vpop.permute.xlu2 %224 }
  0x6f   : > { %v230_v7 = vsel %vm167_vm0, %v225_v6, 0 }
  0x70   : > { %239 = vmatpush.bf16.xpose.msra.mxu2 %v230_v7 }
  0x85   : > { %v166_v8 = vpop.permute.xlu0 %165  ;;  %v345_v9 = vpop.permute.xlu1 %344 }
  0x86   : > { %v172_v10 = vsel %vm167_vm0, %v166_v8, 0  ;;  %v350_v11 = vsel %vm167_vm0, %v345_v9, 0 }
  0x87   : > { %181 = vmatpush.bf16.xpose.msra.mxu0 %v172_v10 }
  0x8d   : > { %v343_v12 = vpop.permute.xlu1 %342 }
  0x8e   : > { %479 = vmatmul.msk.bf16.vlgmr.msra.gmra.mxu0 %vm167_vm0, %v158_v5 }
  0x8f   : > { %359 = vmatpush.bf16.xpose.msrb.mxu0 %v350_v11 }
  0x95   : > { %v223_v13 = vpop.permute.xlu1 %222 }
  0x96   : > { %481 = vmatmul.msk.bf16.vlgmr.msra.gmra.mxu2 %vm167_vm0, %v223_v13 }
  0x9d   : > { %v200_v24 = vpop.permute.xlu1 %199 }
  0x9e   : > { %485 = vmatmul.msk.bf16.vlgmr.msrb.gmra.mxu0 %vm167_vm0, %v343_v12  ;;  %v206_v40 = vsel %vm204_vm1, %v200_v24, 0 }
  0x9f   : > { %215 = vmatpush.bf16.msra.mxu1 %v206_v40 }
  0xa5   : > { %v289_v26 = vpop.permute.xlu1 %288 }
  0xa6   : > { %v294_v41 = vsel %vm167_vm0, %v289_v26, 0 }
  0xa7   : > { %303 = vmatpush.bf16.xpose.msrb.mxu1 %v294_v41 }
  0xad   : > { %v287_v30 = vpop.permute.xlu1 %286 }
 0x10b   : > { %v183_v15 = vpop.f32.mrf.mxu0 }
 0x10c   : > { %v184_v16 = vadd.f32 %v596_v14, %v183_v15 }
 0x10e   : > { %v187_v17 = vsel %vm167_vm0, %v184_v16, -inf }
 0x10f   : > { %188 = vmax.xlane.f32.xlu0 %v187_v17 }
 0x113   : > { %v185_v18 = vpop.f32.mrf.mxu0 }
 0x119   : > { %v241_v23 = vpop.f32.mrf.mxu2 }
 0x11a   : > { %v242_v33 = vadd.f32 %v596_v14, %v241_v23 }
 0x11b   : > { %v361_v19 = vpop.f32.mrf.mxu0 }
 0x11c   : > { %v362_v20 = vadd.f32 %v596_v14, %v361_v19  ;;  %v245_v36 = vsel %vm167_vm0, %v242_v33, -inf }
 0x11e   : > { %v365_v21 = vsel %vm167_vm0, %v362_v20, -inf }
 0x11f   : > { %366 = vmax.xlane.f32.xlu1 %v365_v21 }
 0x121   : > { %v243_v25 = vpop.f32.mrf.mxu2 }
 0x123   : > { %v363_v22 = vpop.f32.mrf.mxu0 }
 0x138   : > { %321 = vrot.lane.b32.xlu1 %v579_v3, %s544_s27 }
 0x182   : > { %v189_v27 = vpop.xlane.xlu0 %188 }
 0x183   : > { %v190_v28 = vsub.f32 %v184_v16, %v189_v27 }
 0x185   : > { %v191_v29 = vmul.f32 1.442695, %v190_v28 }
 0x187   : > { %511 = vpow2.f32 %v191_v29 }
 0x18d   : > { %v512_v31 = vpop.eup %511 }
 0x18e   : > { %v193_v32 = vsel %vm167_vm0, %v512_v31, 0.0 }
 0x18f   : > { %194 = vadd.xlane.f32.xlu2 %v193_v32 }
 0x192   : > { %v367_v34 = vpop.xlane.xlu1 %366 }
 0x193   : > { %v368_v35 = vsub.f32 %v362_v20, %v367_v34 }
 0x195   : > { %v369_v37 = vmul.f32 1.442695, %v368_v35 }
 0x197   : > { %246 = vmax.xlane.f32.xlu2 %v245_v36  ;;  %513 = vpow2.f32 %v369_v37 }
 0x19d   : > { %v514_v38 = vpop.eup %513 }
 0x19e   : > { %v371_v39 = vsel %vm167_vm0, %v514_v38, 0.0 }
 0x19f   : > { %372 = vadd.xlane.f32.xlu2 %v371_v39 }
 0x1aa   : > { %v322_v0 = vpop.permute.xlu1 %321 }
 0x1ab   : > { %v327_v1 = vsel %vm204_vm1, %v322_v0, 0 }
 0x202   : > { %v195_v42 = vpop.xlane.xlu2 %194 }
 0x203   : > { %515 = vrcp.f32 %v195_v42 }
 0x209   : > { %v516_v43 = vpop.eup %515 }
 0x20a   : > { %v247_v44 = vpop.xlane.xlu2 %246  ;;  %v197_v45 = vmul.f32 %v516_v43, %v512_v31 }
 0x20b   : > { %v248_v46 = vsub.f32 %v242_v33, %v247_v44 }
 0x20c   : > { %v198_v47 = vpack.c.bf16 %v197_v45, %v197_v45 }
 0x20d   : > { %v249_v48 = vmul.f32 1.442695, %v248_v46 }
 0x20e   : > { %480 = vmatmul.msk.bf16.vlgmr.msra.gmra.mxu1 %vm167_vm0, %v198_v47 }
 0x20f   : > { %517 = vpow2.f32 %v249_v48 }
 0x212   : > { %v373_v51 = vpop.xlane.xlu2 %372 }
 0x215   : > { %v518_v49 = vpop.eup %517 }
 0x216   : > { %v251_v50 = vsel %vm167_vm0, %v518_v49, 0.0 }
 0x217   : > { %252 = vadd.xlane.f32.xlu2 %v251_v50 }
 0x21e   : > { %483 = vmatmul.msk.bf16.vlgmr.msrb.gmra.mxu1 %vm167_vm0, %v287_v30 }
 0x22f   : > { %257 = vrot.lane.b32.xlu2 %v579_v3, %s543_s26 }
 0x28a   : > { %v253_v52 = vpop.xlane.xlu2 %252 }
 0x28b   : > { %519 = vrcp.f32 %v253_v52  ;;  %v217_v53 = vpop.f32.mrf.mxu1 }
 0x291   : > { %v520_v54 = vpop.eup %519 }
 0x292   : > { %v258_v55 = vpop.permute.xlu2 %257  ;;  %v255_v56 = vmul.f32 %v520_v54, %v518_v49 }
 0x293   : > { %v219_v57 = vpop.f32.mrf.mxu1  ;;  %v263_v58 = vsel %vm204_vm1, %v258_v55, 0 }
 0x294   : > { %272 = vmatpush.bf16.msra.mxu3 %v263_v58  ;;  %v256_v59 = vpack.c.bf16 %v255_v56, %v255_v56 }
 0x297   : > { %482 = vmatmul.msk.bf16.vlgmr.msra.gmra.mxu3 %vm167_vm0, %v256_v59 }
 0x298   : > { %336 = vmatpush.bf16.msrb.mxu3 %v327_v1 }
 0x29b   : > { %v305_v60 = vpop.f32.mrf.mxu1 }
 0x29c   : > { %v306_v61 = vadd.f32 %v596_v14, %v305_v60 }
 0x29e   : > { %v309_v62 = vsel %vm167_vm0, %v306_v61, -inf }
 0x29f   : > { %310 = vmax.xlane.f32.xlu0 %v309_v62 }
 0x2a3   : > { %v307_v63 = vpop.f32.mrf.mxu1 }
 0x2b3   : > { %377 = vrot.lane.b32.xlu0 %v579_v3, %s545_s28 }
 0x312   : > { %v311_v2 = vpop.xlane.xlu0 %310 }
 0x313   : > { %v312_v4 = vsub.f32 %v306_v61, %v311_v2 }
 0x315   : > { %v313_v5 = vmul.f32 1.442695, %v312_v4 }
 0x317   : > { %521 = vpow2.f32 %v313_v5 }
 0x318   : > { %523 = vrcp.f32 %v373_v51 }
 0x31a   : > { %v274_v6 = vpop.f32.mrf.mxu3 }
 0x31d   : > { %v522_v7 = vpop.eup %521 }
 0x31e   : > { %v315_v8 = vsel %vm167_vm0, %v522_v7, 0.0  ;;  %v524_v9 = vpop.eup %523 }
 0x31f   : > { %316 = vadd.xlane.f32.xlu0 %v315_v8  ;;  %v375_v11 = vmul.f32 %v524_v9, %v514_v38 }
 0x321   : > { %v376_v13 = vpack.c.bf16 %v375_v11, %v375_v11 }
 0x322   : > { %v276_v10 = vpop.f32.mrf.mxu3 }
 0x325   : > { %v378_v12 = vpop.permute.xlu0 %377 }
 0x326   : > { %v383_v3 = vsel %vm204_vm1, %v378_v12, 0 }
 0x327   : > { %392 = vmatpush.bf16.msrb.mxu2 %v383_v3 }
 0x32a   : > { %486 = vmatmul.msk.bf16.vlgmr.msrb.gmra.mxu2 %vm167_vm0, %v376_v13 }
 0x392   : > { %v317_v14 = vpop.xlane.xlu0 %316 }
 0x393   : > { %525 = vrcp.f32 %v317_v14 }
 0x399   : > { %v526_v15 = vpop.eup %525 }
 0x39a   : > { %v319_v16 = vmul.f32 %v526_v15, %v522_v7 }
 0x39c   : > { %v320_v17 = vpack.c.bf16 %v319_v16, %v319_v16 }
 0x39e   : > { %484 = vmatmul.msk.bf16.vlgmr.msrb.gmra.mxu3 %vm167_vm0, %v320_v17 }
 0x3ad   : > { %v394_v18 = vpop.f32.mrf.mxu2 }
 0x3ae   : > { %399 = vrot.lane.b32.xlu2 %v394_v18, %s546_s29 }
 0x3b5   : > { %v396_v19 = vpop.f32.mrf.mxu2 }
 0x3b6   : > { %279 = vrot.lane.b32.xlu2 %v274_v6, %s546_s29 }
 0x408   : > { %v400_v20 = vpop.permute.xlu2 %399 }
 0x410   : > { %v280_v21 = vpop.permute.xlu2 %279 }
 0x411   : > { %v282_v22 = vsel %vm167_vm0, %v217_v53, %v280_v21 }
 0x412   : > { %v283_v23 = vpack.c.bf16 %v282_v22, %v282_v22 }
 0x414   : > { %285 = vst.msk [vmem:[%s152_s4] sm:$0xf] %vm284_vm2, %v283_v23 }
 0x421   : > { %v338_v24 = vpop.f32.mrf.mxu3 }
 0x422   : > { %v402_v25 = vsel %vm167_vm0, %v338_v24, %v400_v20 }
 0x423   : > { %v403_v26 = vpack.c.bf16 %v402_v25, %v402_v25 }
 0x425   : > { %405 = vrot.lane.b32.xlu2 %v403_v26, %s547_s5 }
 0x429   : > { %v340_v27 = vpop.f32.mrf.mxu3 }
 0x47f   : > { %v406_v28 = vpop.permute.xlu2 %405 }
 0x480   : > { %409 = vst.msk [vmem:[%s152_s4] sm:$0xf] %vm408_vm3, %v406_v28 }
 0x481 PF: > { %s12_s9 = sadd.s32 1, %s533_s9  }
 0x482   : > { %p9_p4 = scmp.ge.s32.totalorder %s12_s9, 4  }
 0x484   :  { %11 = sbr.rel (!%p9_p4) target bundleno = 1 (0x1), region = 61 }

// kernel: bert_pretrain_forward.19
= control target key start
LH: loop header
LB: loop body
LE: loop exit
PB: predicated region body
PF: predicated region fallthrough
CT: control target
= control target key end

     0   :  { %vm51_vm0 = vcmask 261120   ;;  %v177_v15 = vmov 32.0   ;;  %vm140_vm6 = vcmask 257024   ;;  %s245_s1 = inlined_call_operand.vmem [shape: bf16[32,32], index: 1, kind: input, shape index: {}]   ;;  %s246_s2 = inlined_call_operand.vmem [shape: f32[1,32], index: 2, kind: input, shape index: {}]   ;;  %s247_s0 = inlined_call_operand.vmem [shape: bf16[16,32], index: 0, kind: input, shape index: {}]   ;;  %s248_s3 = inlined_call_operand.vmem [shape: bf16[16,32], index: 3, kind: input, shape index: {}]   ;;  %s249_s4 = inlined_call_operand.vmem [shape: f32[1,32], index: 4, kind: input, shape index: {}]   ;;  %s250_s5 = inlined_call_operand.vmem [shape: f32[1,32], index: 5, kind: input, shape index: {}]   ;;  %s251_s6 = inlined_call_operand.vmem [shape: bf16[16,32], index: 6, kind: output, shape index: {}]  }
   0x1   :  { %v162_v0 = vld [vmem:[%s245_s1 + $0x8] sm:$0xff]  ;;  %v161_v1 = vld [vmem:[%s245_s1] sm:$0xff]  ;;  %171 = vrcp.f32 %v177_v15 }
   0x2   :  { %61 = vmatpush.bf16.msra.mxu0 %v162_v0  ;;  %v160_v2 = vld [vmem:[%s247_s0] sm:$0xff] }
   0x3   :  { %v164_v3 = vld [vmem:[%s248_s3] sm:$0xff]  }
   0x4   :  { %v168_v4 = vld [vmem:[%s246_s2] ss:$0 sm:$0xff]  ;;  %v165_v5 = vunpack.c.l.bf16 %v164_v3  ;;  %v166_v10 = vunpack.c.h.bf16 %v164_v3 }
   0x5   :  { %v169_v46 = vld [vmem:[%s249_s4] ss:$0 sm:$0xff] }
   0x6   :  { %62 = vmatpush.bf16.msra.mxu0 %v161_v1  ;;  %v170_v49 = vld [vmem:[%s250_s5] ss:$0 sm:$0xff] }
   0x7   :  { %v172_v16 = vpop.eup %171 }
   0x8   :  { %v82_v17 = vmul.f32 32.0, %v172_v16  ;;  %vm86_vm1 = vweird.f32 %v172_v16 }
   0x9   :  { %159 = vmatmul.msk.bf16.vlgmr.msra.gmra.mxu0 %vm51_vm0, %v160_v2 }
   0xa   :  { %v83_v18 = vsub.f32 1.0, %v82_v17 }
   0xc   :  { %v84_v19 = vmul.f32 %v172_v16, %v83_v18 }
   0xe   :  { %v85_v20 = vadd.f32 %v172_v16, %v84_v19 }
  0x10   :  { %v87_v21 = vsel %vm86_vm1, %v172_v16, %v85_v20 }
  0x86   :  { %v64_v6 = vpop.f32.mrf.mxu0 }
  0x87   :  { %v65_v7 = vadd.f32 %v168_v4, %v64_v6 }
  0x89   :  { %v73_v8 = vadd.f32 %v165_v5, %v65_v7 }
  0x8b   :  { %v75_v9 = vsel %vm51_vm0, %v73_v8, 0.0 }
  0x8c   :  { %76 = vadd.xlane.f32.xlu0 %v75_v9 }
  0x8e   :  { %v66_v11 = vpop.f32.mrf.mxu0 }
  0x8f   :  { %v67_v12 = vadd.f32 %v168_v4, %v66_v11 }
  0x91   :  { %v74_v13 = vadd.f32 %v166_v10, %v67_v12 }
  0x93   :  { %v78_v14 = vsel %vm51_vm0, %v74_v13, 0.0 }
  0x94   :  { %79 = vadd.xlane.f32.xlu0 %v78_v14 }
  0xff   :  { %v77_v22 = vpop.xlane.xlu0 %76 }
 0x100   :  { %v88_v23 = vmul.f32 %v87_v21, %v77_v22 }
 0x102   :  { %v90_v24 = vsub.f32 %v73_v8, %v88_v23 }
 0x104   :  { %v92_v25 = vmul.f32 %v90_v24, %v90_v24 }
 0x106   :  { %v94_v26 = vsel %vm51_vm0, %v92_v25, 0.0 }
 0x107   :  { %95 = vadd.xlane.f32.xlu1 %v94_v26  ;;  %v80_v27 = vpop.xlane.xlu0 %79 }
 0x108   :  { %v89_v28 = vmul.f32 %v87_v21, %v80_v27 }
 0x10a   :  { %v91_v29 = vsub.f32 %v74_v13, %v89_v28 }
 0x10c   :  { %v93_v30 = vmul.f32 %v91_v29, %v91_v29 }
 0x10e   :  { %v97_v31 = vsel %vm51_vm0, %v93_v30, 0.0 }
 0x10f   :  { %98 = vadd.xlane.f32.xlu1 %v97_v31 }
 0x17a   :  { %v96_v32 = vpop.xlane.xlu1 %95 }
 0x17b   :  { %v100_v33 = vmul.f32 %v96_v32, %v87_v21 }
 0x17d   :  { %v102_v34 = vadd.f32 1e-12, %v100_v33 }
 0x17f   :  { %173 = vrsqrt.f32 %v102_v34  ;;  %vm110_vm3 = vweird.f32 %v102_v34 }
 0x182   :  { %v99_v35 = vpop.xlane.xlu1 %98 }
 0x183   :  { %v101_v36 = vmul.f32 %v99_v35, %v87_v21 }
 0x185   :  { %v174_v37 = vpop.eup %173  ;;  %v103_v38 = vadd.f32 1e-12, %v101_v36 }
 0x186   :  { %v105_v39 = vmul.f32 %v174_v37, %v102_v34  ;;  %vm111_vm2 = vweird.f32 %v174_v37 }
 0x187   :  { %175 = vrsqrt.f32 %v103_v38  ;;  %vm112_vm4 = vmor %vm110_vm3, %vm111_vm2  ;;  %vm120_vm7 = vweird.f32 %v103_v38 }
 0x188   :  { %v106_v40 = vmul.f32 %v174_v37, %v105_v39 }
 0x18a   :  { %v107_v41 = vmul.f32 0.5, %v106_v40 }
 0x18c   :  { %v108_v42 = vsub.f32 1.5, %v107_v41 }
 0x18d   :  { %v176_v43 = vpop.eup %175 }
 0x18e   :  { %v109_v44 = vmul.f32 %v174_v37, %v108_v42  ;;  %v115_v45 = vmul.f32 %v176_v43, %v103_v38  ;;  %vm121_vm5 = vweird.f32 %v176_v43 }
 0x18f   :  { %vm122_vm8 = vmor %vm120_vm7, %vm121_vm5 }
 0x190   :  { %v113_v47 = vsel %vm112_vm4, %v174_v37, %v109_v44  ;;  %v116_v48 = vmul.f32 %v176_v43, %v115_v45 }
 0x191   :  { %v124_v50 = vmul.f32 %v113_v47, %v90_v24 }
 0x192   :  { %v117_v51 = vmul.f32 0.5, %v116_v48 }
 0x193   :  { %v130_v52 = vmul.f32 %v169_v46, %v124_v50 }
 0x194   :  { %v118_v53 = vsub.f32 1.5, %v117_v51 }
 0x195   :  { %v136_v54 = vadd.f32 %v170_v49, %v130_v52 }
 0x196   :  { %v119_v55 = vmul.f32 %v176_v43, %v118_v53 }
 0x197   :  { %v138_v56 = vpack.c.bf16 %v136_v54, %v136_v54 }
 0x198   :  { %v123_v57 = vsel %vm122_vm8, %v176_v43, %v119_v55 }
 0x199   :  { %141 = vst.msk [vmem:[%s251_s6] sm:$0xf] %vm140_vm6, %v138_v56  ;;  %v125_v58 = vmul.f32 %v123_v57, %v91_v29 }
 0x19b   :  { %v131_v59 = vmul.f32 %v169_v46, %v125_v58 }
 0x19d   :  { %v137_v60 = vadd.f32 %v170_v49, %v131_v59 }
 0x19f   :  { %v139_v61 = vpack.c.bf16 %v137_v60, %v137_v60 }
 0x1a1   :  { %142 = vst.msk [vmem:[%s251_s6 + $0x4] sm:$0xf] %vm140_vm6, %v139_v61 }

// kernel: bert_pretrain_forward.20
= control target key start
LH: loop header
LB: loop body
LE: loop exit
PB: predicated region body
PF: predicated region fallthrough
CT: control target
= control target key end

     0   :  { %vm42_vm0 = vcmask 261120   ;;  %vm150_vm8 = vcmask 519168   ;;  %s231_s1 = inlined_call_operand.vmem [shape: bf16[32,64], index: 1, kind: input, shape index: {}]   ;;  %s232_s2 = inlined_call_operand.vmem [shape: f32[1,64], index: 2, kind: input, shape index: {}]   ;;  %s233_s0 = inlined_call_operand.vmem [shape: bf16[16,32], index: 0, kind: input, shape index: {}]   ;;  %s234_s3 = inlined_call_operand.vmem [shape: bf16[16,64], index: 3, kind: output, shape index: {}]  }
   0x1   :  { %v174_v0 = vld [vmem:[%s231_s1 + $0x8] sm:$0xff]  ;;  %v173_v1 = vld [vmem:[%s231_s1] sm:$0xff] }
   0x2   :  { %52 = vmatpush.bf16.msra.mxu0 %v174_v0  ;;  %v172_v2 = vld [vmem:[%s233_s0] sm:$0xff] }
   0x3   :  { %v175_v3 = vld [vmem:[%s232_s2] ss:$0 sm:$0xff] }
   0x6   :  { %53 = vmatpush.bf16.msra.mxu0 %v173_v1 }
   0x9   :  { %169 = vmatmul.msk.bf16.vlgmr.msra.gmra.mxu0 %vm42_vm0, %v172_v2 }
  0x86   :  { %v55_v4 = vpop.f32.mrf.mxu0 }
  0x87   :  { %v212_v5 = vadd.f32 %v175_v3, %v55_v4 }
  0x89   :  { %v62_v6 = vmul.f32 0.70710677, %v212_v5 }
  0x8b   :  { %v64_v7 = vmul.f32 %v62_v6, %v62_v6 }
  0x8d   :  { %v65_v8 = vmin.f32 %v64_v7, 16.0 }
  0x8e   :  { %v57_v9 = vpop.f32.mrf.mxu0 }
  0x8f   :  { %v66_v10 = vmul.f32 2.1237322e-06, %v65_v8  ;;  %v77_v11 = vmul.f32 3.8918573e-05, %v65_v8  ;;  %v215_v12 = vadd.f32 %v175_v3, %v57_v9 }
  0x91   :  { %v67_v13 = vadd.f32 0.00028619796, %v66_v10  ;;  %v78_v14 = vadd.f32 0.001143296, %v77_v11  ;;  %v218_v15 = vmul.f32 0.70710677, %v215_v12 }
  0x92   :  { %v60_v11 = vmul.f32 0.5, %v212_v5  ;;  %v61_v5 = vmul.f32 0.5, %v215_v12 }
  0x93   :  { %v68_v16 = vmul.f32 %v67_v13, %v65_v8  ;;  %v79_v17 = vmul.f32 %v78_v14, %v65_v8  ;;  %v104_v18 = vmul.f32 %v218_v15, %v218_v15 }
  0x95   :  { %v80_v19 = vadd.f32 0.014752088, %v79_v17  ;;  %v69_v20 = vadd.f32 0.0036580483, %v68_v16  ;;  %v105_v21 = vmin.f32 %v104_v18, 16.0 }
  0x97   :  { %v81_v22 = vmul.f32 %v80_v19, %v65_v8  ;;  %v106_v23 = vmul.f32 2.1237322e-06, %v105_v21  ;;  %v117_v24 = vmul.f32 3.8918573e-05, %v105_v21  ;;  %v70_v26 = vmul.f32 %v69_v20, %v65_v8 }
  0x99   :  { %v82_v25 = vadd.f32 0.112945676, %v81_v22  ;;  %v107_v27 = vadd.f32 0.00028619796, %v106_v23  ;;  %v118_v28 = vadd.f32 0.001143296, %v117_v24 }
  0x9a   :  { %v71_v33 = vadd.f32 0.05243302, %v70_v26 }
  0x9b   :  { %v83_v29 = vmul.f32 %v82_v25, %v65_v8  ;;  %v108_v30 = vmul.f32 %v107_v27, %v105_v21  ;;  %v119_v31 = vmul.f32 %v118_v28, %v105_v21 }
  0x9c   :  { %v72_v39 = vmul.f32 %v71_v33, %v65_v8 }
  0x9d   :  { %v84_v32 = vadd.f32 0.4994258, %v83_v29  ;;  %v120_v34 = vadd.f32 0.014752088, %v119_v31  ;;  %v109_v36 = vadd.f32 0.0036580483, %v108_v30 }
  0x9e   :  { %v73_v43 = vadd.f32 0.18741608, %v72_v39 }
  0x9f   :  { %v85_v35 = vmul.f32 %v84_v32, %v65_v8  ;;  %v121_v37 = vmul.f32 %v120_v34, %v105_v21  ;;  %v110_v41 = vmul.f32 %v109_v36, %v105_v21 }
  0xa0   :  { %v74_v48 = vmul.f32 %v73_v43, %v65_v8 }
  0xa1   :  { %v86_v38 = vadd.f32 1.0, %v85_v35  ;;  %v122_v40 = vadd.f32 0.112945676, %v121_v37  ;;  %v111_v45 = vadd.f32 0.05243302, %v110_v41 }
  0xa2   :  { %v75_v54 = vadd.f32 1.1283791, %v74_v48 }
  0xa3   :  { %176 = vrcp.f32 %v86_v38  ;;  %v123_v42 = vmul.f32 %v122_v40, %v105_v21  ;;  %v112_v51 = vmul.f32 %v111_v45, %v105_v21  ;;  %v98_v53 = vand.u32 2147483648, %v86_v38 }
  0xa4   :  { %v96_v56 = vand.u32 2147483647, %v86_v38  ;;  %vm92_vm2 = vweird.f32 %v86_v38  ;;  %v76_v61 = vmul.f32 %v75_v54, %v62_v6 }
  0xa5   :  { %v124_v44 = vadd.f32 0.4994258, %v123_v42  ;;  %v113_v57 = vadd.f32 0.18741608, %v112_v51  ;;  %v99_v59 = vor.u32 1.1754944e-38, %v98_v53 }
  0xa6   :  { %vm97_vm4 = vcmp.eq.f32.partialorder %v96_v56, 8.507059e+37 }
  0xa7   :  { %v125_v46 = vmul.f32 %v124_v44, %v105_v21  ;;  %v114_v0 = vmul.f32 %v113_v57, %v105_v21 }
  0xa9   :  { %v177_v47 = vpop.eup %176  ;;  %v126_v50 = vadd.f32 1.0, %v125_v46  ;;  %v115_v8 = vadd.f32 1.1283791, %v114_v0 }
  0xaa   :  { %v88_v49 = vmul.f32 %v177_v47, %v86_v38  ;;  %vm93_vm1 = vweird.f32 %v177_v47 }
  0xab   :  { %178 = vrcp.f32 %v126_v50  ;;  %vm94_vm3 = vmor %vm92_vm2, %vm93_vm1  ;;  %v138_v7 = vand.u32 2147483648, %v126_v50  ;;  %v136_v10 = vand.u32 2147483647, %v126_v50  ;;  %vm132_vm6 = vweird.f32 %v126_v50 }
  0xac   :  { %v89_v52 = vsub.f32 1.0, %v88_v49  ;;  %v116_v17 = vmul.f32 %v115_v8, %v218_v15 }
  0xad   :  { %v139_v6 = vor.u32 1.1754944e-38, %v138_v7  ;;  %vm137_vm9 = vcmp.eq.f32.partialorder %v136_v10, 8.507059e+37 }
  0xae   :  { %v90_v55 = vmul.f32 %v177_v47, %v89_v52 }
  0xb0   :  { %v91_v58 = vadd.f32 %v177_v47, %v90_v55 }
  0xb1   :  { %v179_v60 = vpop.eup %178 }
  0xb2   :  { %v95_v62 = vsel %vm94_vm3, %v177_v47, %v91_v58  ;;  %v128_v1 = vmul.f32 %v179_v60, %v126_v50  ;;  %vm133_vm5 = vweird.f32 %v179_v60 }
  0xb3   :  { %v100_v63 = vsel %vm97_vm4, %v99_v59, %v95_v62  ;;  %vm134_vm7 = vmor %vm132_vm6, %vm133_vm5 }
  0xb4   :  { %v101_v2 = vmul.f32 %v100_v63, %v76_v61  ;;  %v129_v3 = vsub.f32 1.0, %v128_v1 }
  0xb6   :  { %v170_v4 = vclamps-f32 %v101_v2, 1.0  ;;  %v130_v9 = vmul.f32 %v179_v60, %v129_v3 }
  0xb8   :  { %v144_v13 = vadd.f32 1.0, %v170_v4  ;;  %v131_v14 = vadd.f32 %v179_v60, %v130_v9 }
  0xba   :  { %v146_v16 = vmul.f32 %v144_v13, %v60_v11  ;;  %v135_v18 = vsel %vm134_vm7, %v179_v60, %v131_v14 }
  0xbb   :  { %v140_v20 = vsel %vm137_vm9, %v139_v6, %v135_v18 }
  0xbc   :  { %v148_v19 = vpack.c.bf16 %v146_v16, %v146_v16  ;;  %v141_v21 = vmul.f32 %v140_v20, %v116_v17 }
  0xbe   :  { %151 = vst.msk [vmem:[%s234_s3] sm:$0xf] %vm150_vm8, %v148_v19  ;;  %v171_v22 = vclamps-f32 %v141_v21, 1.0 }
  0xc0   :  { %v145_v23 = vadd.f32 1.0, %v171_v22 }
  0xc2   :  { %v147_v24 = vmul.f32 %v145_v23, %v61_v5 }
  0xc4   :  { %v149_v25 = vpack.c.bf16 %v147_v24, %v147_v24 }
  0xc6   :  { %152 = vst.msk [vmem:[%s234_s3 + $0x4] sm:$0xf] %vm150_vm8, %v149_v25 }

// kernel: bert_pretrain_forward.21
= control target key start
LH: loop header
LB: loop body
LE: loop exit
PB: predicated region body
PF: predicated region fallthrough
CT: control target
= control target key end

     0   :  { %vm67_vm0 = vcmask 523264   ;;  %vm91_vm1 = vcmask 261120   ;;  %v204_v17 = vmov 32.0   ;;  %vm157_vm7 = vcmask 257024   ;;  %s277_s1 = inlined_call_operand.vmem [shape: bf16[64,32], index: 1, kind: input, shape index: {}]   ;;  %s278_s2 = inlined_call_operand.vmem [shape: f32[1,32], index: 2, kind: input, shape index: {}]   ;;  %s279_s0 = inlined_call_operand.vmem [shape: bf16[16,64], index: 0, kind: input, shape index: {}]   ;;  %s280_s3 = inlined_call_operand.vmem [shape: bf16[16,32], index: 3, kind: input, shape index: {}]   ;;  %s281_s4 = inlined_call_operand.vmem [shape: f32[1,32], index: 4, kind: input, shape index: {}]   ;;  %s282_s5 = inlined_call_operand.vmem [shape: f32[1,32], index: 5, kind: input, shape index: {}]   ;;  %s283_s6 = inlined_call_operand.vmem [shape: bf16[16,32], index: 6, kind: output, shape index: {}]  }
   0x1   :  { %v189_v0 = vld [vmem:[%s277_s1 + $0x18] sm:$0xff]  ;;  %v188_v1 = vld [vmem:[%s277_s1 + $0x10] sm:$0xff]  ;;  %v187_v2 = vld [vmem:[%s277_s1 + $0x8] sm:$0xff]  ;;  %198 = vrcp.f32 %v204_v17 }
   0x2   :  { %75 = vmatpush.bf16.msra.mxu0 %v189_v0  ;;  %v186_v3 = vld [vmem:[%s277_s1] sm:$0xff] }
   0x3   :  { %v185_v4 = vld [vmem:[%s279_s0] sm:$0xff] }
   0x4   :  { %v191_v5 = vld [vmem:[%s280_s3] sm:$0xff]  }
   0x5   :  { %v195_v6 = vld [vmem:[%s278_s2] ss:$0 sm:$0xff]  ;;  %v192_v7 = vunpack.c.l.bf16 %v191_v5  ;;  %v193_v12 = vunpack.c.h.bf16 %v191_v5 }
   0x6   :  { %76 = vmatpush.bf16.msra.mxu0 %v188_v1  ;;  %v196_v48 = vld [vmem:[%s281_s4] ss:$0 sm:$0xff] }
   0x7   :  { %v199_v18 = vpop.eup %198  ;;  %v197_v51 = vld [vmem:[%s282_s5] ss:$0 sm:$0xff] }
   0x8   :  { %v99_v19 = vmul.f32 32.0, %v199_v18  ;;  %vm103_vm2 = vweird.f32 %v199_v18 }
   0xa   :  { %77 = vmatpush.bf16.msra.mxu0 %v187_v2  ;;  %v100_v20 = vsub.f32 1.0, %v99_v19 }
   0xc   :  { %v101_v21 = vmul.f32 %v199_v18, %v100_v20 }
   0xe   :  { %78 = vmatpush.bf16.msra.mxu0 %v186_v3  ;;  %v102_v22 = vadd.f32 %v199_v18, %v101_v21 }
  0x10   :  { %v104_v23 = vsel %vm103_vm2, %v199_v18, %v102_v22 }
  0x11   :  { %184 = vmatmul.msk.bf16.vlgmr.msra.gmra.mxu0 %vm67_vm0, %v185_v4 }
  0x8e   :  { %v80_v8 = vpop.f32.mrf.mxu0 }
  0x8f   :  { %v81_v9 = vadd.f32 %v195_v6, %v80_v8 }
  0x91   :  { %v89_v10 = vadd.f32 %v192_v7, %v81_v9 }
  0x93   :  { %v92_v11 = vsel %vm91_vm1, %v89_v10, 0.0 }
  0x94   :  { %93 = vadd.xlane.f32.xlu0 %v92_v11 }
  0x96   :  { %v82_v13 = vpop.f32.mrf.mxu0 }
  0x97   :  { %v83_v14 = vadd.f32 %v195_v6, %v82_v13 }
  0x99   :  { %v90_v15 = vadd.f32 %v193_v12, %v83_v14 }
  0x9b   :  { %v95_v16 = vsel %vm91_vm1, %v90_v15, 0.0 }
  0x9c   :  { %96 = vadd.xlane.f32.xlu0 %v95_v16 }
 0x107   :  { %v94_v24 = vpop.xlane.xlu0 %93 }
 0x108   :  { %v105_v25 = vmul.f32 %v104_v23, %v94_v24 }
 0x10a   :  { %v107_v26 = vsub.f32 %v89_v10, %v105_v25 }
 0x10c   :  { %v109_v27 = vmul.f32 %v107_v26, %v107_v26 }
 0x10e   :  { %v111_v28 = vsel %vm91_vm1, %v109_v27, 0.0 }
 0x10f   :  { %112 = vadd.xlane.f32.xlu1 %v111_v28  ;;  %v97_v29 = vpop.xlane.xlu0 %96 }
 0x110   :  { %v106_v30 = vmul.f32 %v104_v23, %v97_v29 }
 0x112   :  { %v108_v31 = vsub.f32 %v90_v15, %v106_v30 }
 0x114   :  { %v110_v32 = vmul.f32 %v108_v31, %v108_v31 }
 0x116   :  { %v114_v33 = vsel %vm91_vm1, %v110_v32, 0.0 }
 0x117   :  { %115 = vadd.xlane.f32.xlu1 %v114_v33 }
 0x182   :  { %v113_v34 = vpop.xlane.xlu1 %112 }
 0x183   :  { %v117_v35 = vmul.f32 %v113_v34, %v104_v23 }
 0x185   :  { %v119_v36 = vadd.f32 1e-12, %v117_v35 }
 0x187   :  { %200 = vrsqrt.f32 %v119_v36  ;;  %vm127_vm4 = vweird.f32 %v119_v36 }
 0x18a   :  { %v116_v37 = vpop.xlane.xlu1 %115 }
 0x18b   :  { %v118_v38 = vmul.f32 %v116_v37, %v104_v23 }
 0x18d   :  { %v201_v39 = vpop.eup %200  ;;  %v120_v40 = vadd.f32 1e-12, %v118_v38 }
 0x18e   :  { %v122_v41 = vmul.f32 %v201_v39, %v119_v36  ;;  %vm128_vm3 = vweird.f32 %v201_v39 }
 0x18f   :  { %202 = vrsqrt.f32 %v120_v40  ;;  %vm129_vm5 = vmor %vm127_vm4, %vm128_vm3  ;;  %vm137_vm8 = vweird.f32 %v120_v40 }
 0x190   :  { %v123_v42 = vmul.f32 %v201_v39, %v122_v41 }
 0x192   :  { %v124_v43 = vmul.f32 0.5, %v123_v42 }
 0x194   :  { %v125_v44 = vsub.f32 1.5, %v124_v43 }
 0x195   :  { %v203_v45 = vpop.eup %202 }
 0x196   :  { %v126_v46 = vmul.f32 %v201_v39, %v125_v44  ;;  %v132_v47 = vmul.f32 %v203_v45, %v120_v40  ;;  %vm138_vm6 = vweird.f32 %v203_v45 }
 0x197   :  { %vm139_vm9 = vmor %vm137_vm8, %vm138_vm6 }
 0x198   :  { %v130_v49 = vsel %vm129_vm5, %v201_v39, %v126_v46  ;;  %v133_v50 = vmul.f32 %v203_v45, %v132_v47 }
 0x199   :  { %v141_v52 = vmul.f32 %v130_v49, %v107_v26 }
 0x19a   :  { %v134_v53 = vmul.f32 0.5, %v133_v50 }
 0x19b   :  { %v147_v54 = vmul.f32 %v196_v48, %v141_v52 }
 0x19c   :  { %v135_v55 = vsub.f32 1.5, %v134_v53 }
 0x19d   :  { %v153_v56 = vadd.f32 %v197_v51, %v147_v54 }
 0x19e   :  { %v136_v57 = vmul.f32 %v203_v45, %v135_v55 }
 0x19f   :  { %v155_v58 = vpack.c.bf16 %v153_v56, %v153_v56 }
 0x1a0   :  { %v140_v59 = vsel %vm139_vm9, %v203_v45, %v136_v57 }
 0x1a1   :  { %158 = vst.msk [vmem:[%s283_s6] sm:$0xf] %vm157_vm7, %v155_v58  ;;  %v142_v60 = vmul.f32 %v140_v59, %v108_v31 }
 0x1a3   :  { %v148_v61 = vmul.f32 %v196_v48, %v142_v60 }
 0x1a5   :  { %v154_v62 = vadd.f32 %v197_v51, %v148_v61 }
 0x1a7   :  { %v156_v63 = vpack.c.bf16 %v154_v62, %v154_v62 }
 0x1a9   :  { %159 = vst.msk [vmem:[%s283_s6 + $0x4] sm:$0xf] %vm157_vm7, %v156_v63 }

// kernel: bert_pretrain_forward.29
= control target key start
LH: loop header
LB: loop body
LE: loop exit
PB: predicated region body
PF: predicated region fallthrough
CT: control target
= control target key end

     0   :  { %vm36_vm0 = vcmask 261120   ;;  %vm98_vm5 = vcmask 257024   ;;  %s154_s1 = inlined_call_operand.vmem [shape: bf16[32,32], index: 1, kind: input, shape index: {}]   ;;  %s155_s2 = inlined_call_operand.vmem [shape: f32[1,32], index: 2, kind: input, shape index: {}]   ;;  %s156_s0 = inlined_call_operand.vmem [shape: bf16[8,32], index: 0, kind: input, shape index: {}]   ;;  %s157_s3 = inlined_call_operand.vmem [shape: bf16[8,32], index: 3, kind: output, shape index: {}]  }
   0x1   :  { %v115_v0 = vld [vmem:[%s154_s1 + $0x8] sm:$0xff]  ;;  %v114_v1 = vld [vmem:[%s154_s1] sm:$0xff] }
   0x2   :  { %46 = vmatpush.bf16.msra.mxu0 %v115_v0  ;;  %v15_v2 = vld [vmem:[%s156_s0] sm:$0xf] }
   0x3   :  { %v116_v3 = vld [vmem:[%s155_s2] ss:$0 sm:$0xff] }
   0x6   :  { %47 = vmatpush.bf16.msra.mxu0 %v114_v1 }
   0x9   :  { %112 = vmatmul.msk.bf16.vlgmr.msra.gmra.mxu0 %vm36_vm0, %v15_v2 }
  0x86   :  { %v49_v4 = vpop.f32.mrf.mxu0 }
  0x87   :  { %v50_v5 = vadd.f32 %v116_v3, %v49_v4 }
  0x89   :  { %v54_v6 = vmul.f32 0.70710677, %v50_v5  ;;  %v53_v43 = vmul.f32 0.5, %v50_v5 }
  0x8b   :  { %v55_v7 = vmul.f32 %v54_v6, %v54_v6 }
  0x8d   :  { %v56_v8 = vmin.f32 %v55_v7, 16.0 }
  0x8e   :  { %v51_v9 = vpop.f32.mrf.mxu0 }
  0x8f   :  { %v57_v10 = vmul.f32 2.1237322e-06, %v56_v8  ;;  %v68_v11 = vmul.f32 3.8918573e-05, %v56_v8 }
  0x91   :  { %v58_v12 = vadd.f32 0.00028619796, %v57_v10  ;;  %v69_v13 = vadd.f32 0.001143296, %v68_v11 }
  0x93   :  { %v59_v14 = vmul.f32 %v58_v12, %v56_v8  ;;  %v70_v15 = vmul.f32 %v69_v13, %v56_v8 }
  0x95   :  { %v71_v16 = vadd.f32 0.014752088, %v70_v15  ;;  %v60_v17 = vadd.f32 0.0036580483, %v59_v14 }
  0x97   :  { %v72_v18 = vmul.f32 %v71_v16, %v56_v8  ;;  %v61_v20 = vmul.f32 %v60_v17, %v56_v8 }
  0x99   :  { %v73_v19 = vadd.f32 0.112945676, %v72_v18  ;;  %v62_v23 = vadd.f32 0.05243302, %v61_v20 }
  0x9b   :  { %v74_v21 = vmul.f32 %v73_v19, %v56_v8  ;;  %v63_v26 = vmul.f32 %v62_v23, %v56_v8 }
  0x9d   :  { %v75_v22 = vadd.f32 0.4994258, %v74_v21  ;;  %v64_v27 = vadd.f32 0.18741608, %v63_v26 }
  0x9f   :  { %v76_v24 = vmul.f32 %v75_v22, %v56_v8  ;;  %v65_v29 = vmul.f32 %v64_v27, %v56_v8 }
  0xa1   :  { %v77_v25 = vadd.f32 1.0, %v76_v24  ;;  %v66_v33 = vadd.f32 1.1283791, %v65_v29 }
  0xa3   :  { %117 = vrcp.f32 %v77_v25  ;;  %v89_v32 = vand.u32 2147483648, %v77_v25  ;;  %v87_v35 = vand.u32 2147483647, %v77_v25  ;;  %vm83_vm2 = vweird.f32 %v77_v25 }
  0xa4   :  { %v67_v38 = vmul.f32 %v66_v33, %v54_v6 }
  0xa5   :  { %v90_v37 = vor.u32 1.1754944e-38, %v89_v32  ;;  %vm88_vm4 = vcmp.eq.f32.partialorder %v87_v35, 8.507059e+37 }
  0xa9   :  { %v118_v28 = vpop.eup %117 }
  0xaa   :  { %v79_v30 = vmul.f32 %v118_v28, %v77_v25  ;;  %vm84_vm1 = vweird.f32 %v118_v28 }
  0xab   :  { %vm85_vm3 = vmor %vm83_vm2, %vm84_vm1 }
  0xac   :  { %v80_v31 = vsub.f32 1.0, %v79_v30 }
  0xae   :  { %v81_v34 = vmul.f32 %v118_v28, %v80_v31 }
  0xb0   :  { %v82_v36 = vadd.f32 %v118_v28, %v81_v34 }
  0xb2   :  { %v86_v39 = vsel %vm85_vm3, %v118_v28, %v82_v36 }
  0xb3   :  { %v91_v40 = vsel %vm88_vm4, %v90_v37, %v86_v39 }
  0xb4   :  { %v92_v41 = vmul.f32 %v91_v40, %v67_v38 }
  0xb6   :  { %v113_v42 = vclamps-f32 %v92_v41, 1.0 }
  0xb8   :  { %v95_v44 = vadd.f32 1.0, %v113_v42 }
  0xba   :  { %v96_v45 = vmul.f32 %v95_v44, %v53_v43 }
  0xbc   :  { %v97_v46 = vpack.c.bf16 %v96_v45, %v96_v45 }
  0xbe   :  { %99 = vst.msk [vmem:[%s157_s3] sm:$0xf] %vm98_vm5, %v97_v46 }

// kernel: bert_pretrain_forward.30
= control target key start
LH: loop header
LB: loop body
LE: loop exit
PB: predicated region body
PF: predicated region fallthrough
CT: control target
= control target key end

     0   :  { %vm16_vm0 = vcmask 261120   ;;  %v70_v3 = vmov 32.0   ;;  %vm57_vm5 = vcmask 257024   ;;  %s105_s0 = inlined_call_operand.vmem [shape: bf16[8,32], index: 0, kind: input, shape index: {}]   ;;  %s106_s1 = inlined_call_operand.vmem [shape: f32[1,32], index: 1, kind: input, shape index: {}]   ;;  %s107_s2 = inlined_call_operand.vmem [shape: f32[1,32], index: 2, kind: input, shape index: {}]   ;;  %s108_s3 = inlined_call_operand.vmem [shape: bf16[8,32], index: 3, kind: output, shape index: {}]  }
   0x1   :  { %v14_v0 = vld [vmem:[%s105_s0] sm:$0xf]  ;;  %66 = vrcp.f32 %v70_v3 }
   0x2   :  { %v15_v1 = vunpack.c.l.bf16 %v14_v0  ;;  %v64_v24 = vld [vmem:[%s106_s1] ss:$0 sm:$0xff] }
   0x3   :  { %v65_v26 = vld [vmem:[%s107_s2] ss:$0 sm:$0xff] }
   0x4   :  { %v17_v2 = vsel %vm16_vm0, %v15_v1, 0.0 }
   0x5   :  { %18 = vadd.xlane.f32.xlu0 %v17_v2 }
   0x7   :  { %v67_v4 = vpop.eup %66 }
   0x8   :  { %v21_v5 = vmul.f32 32.0, %v67_v4  ;;  %vm25_vm1 = vweird.f32 %v67_v4 }
   0xa   :  { %v22_v6 = vsub.f32 1.0, %v21_v5 }
   0xc   :  { %v23_v7 = vmul.f32 %v67_v4, %v22_v6 }
   0xe   :  { %v24_v8 = vadd.f32 %v67_v4, %v23_v7 }
  0x10   :  { %v26_v9 = vsel %vm25_vm1, %v67_v4, %v24_v8 }
  0x78   :  { %v19_v10 = vpop.xlane.xlu0 %18 }
  0x79   :  { %v27_v11 = vmul.f32 %v26_v9, %v19_v10 }
  0x7b   :  { %v28_v12 = vsub.f32 %v15_v1, %v27_v11 }
  0x7d   :  { %v29_v13 = vmul.f32 %v28_v12, %v28_v12 }
  0x7f   :  { %v30_v14 = vsel %vm16_vm0, %v29_v13, 0.0 }
  0x80   :  { %31 = vadd.xlane.f32.xlu0 %v30_v14 }
  0xf3   :  { %v32_v15 = vpop.xlane.xlu0 %31 }
  0xf4   :  { %v33_v16 = vmul.f32 %v32_v15, %v26_v9 }
  0xf6   :  { %v34_v17 = vadd.f32 1e-12, %v33_v16 }
  0xf8   :  { %68 = vrsqrt.f32 %v34_v17  ;;  %vm41_vm3 = vweird.f32 %v34_v17 }
  0xfe   :  { %v69_v18 = vpop.eup %68 }
  0xff   :  { %v36_v19 = vmul.f32 %v69_v18, %v34_v17  ;;  %vm42_vm2 = vweird.f32 %v69_v18 }
 0x100   :  { %vm43_vm4 = vmor %vm41_vm3, %vm42_vm2 }
 0x101   :  { %v37_v20 = vmul.f32 %v69_v18, %v36_v19 }
 0x103   :  { %v38_v21 = vmul.f32 0.5, %v37_v20 }
 0x105   :  { %v39_v22 = vsub.f32 1.5, %v38_v21 }
 0x107   :  { %v40_v23 = vmul.f32 %v69_v18, %v39_v22 }
 0x109   :  { %v44_v25 = vsel %vm43_vm4, %v69_v18, %v40_v23 }
 0x10a   :  { %v45_v27 = vmul.f32 %v44_v25, %v28_v12 }
 0x10c   :  { %v50_v28 = vmul.f32 %v64_v24, %v45_v27 }
 0x10e   :  { %v55_v29 = vadd.f32 %v65_v26, %v50_v28 }
 0x110   :  { %v56_v30 = vpack.c.bf16 %v55_v29, %v55_v29 }
 0x112   :  { %58 = vst.msk [vmem:[%s108_s3] sm:$0xf] %vm57_vm5, %v56_v30 }

// kernel: bert_pretrain_forward.31
= control target key start
LH: loop header
LB: loop body
LE: loop exit
PB: predicated region body
PF: predicated region fallthrough
CT: control target
= control target key end

     0   :  { %vm76_vm0 = vcmask 261120   ;;  %s266_s0 = inlined_call_operand.vmem [shape: bf16[8,32], index: 0, kind: input, shape index: {}]   ;;  %s267_s1 = inlined_call_operand.vmem [shape: bf16[128,32], index: 1, kind: input, shape index: {}]   ;;  %s268_s2 = inlined_call_operand.vmem [shape: f32[1,128], index: 2, kind: input, shape index: {}]   ;;  %s269_s3 = inlined_call_operand.hbm [shape: f32[8,128], index: 3, kind: output, shape index: {}]  }
   0x1   :  { %v174_v0 = vld [vmem:[%s267_s1 + $0x38] sm:$0xff] }
   0x2   :  { %v102_v1 = vsel %vm76_vm0, %v174_v0, 0 }
   0x3   :  { %8 = vsyncpa [#allocation3], 0  ;;  %104 = vmatpush.bf16.xpose.msra.mxu0 %v102_v1  ;;  %v173_v2 = vld [vmem:[%s267_s1 + $0x30] sm:$0xff]  ;;  %v172_v4 = vld [vmem:[%s267_s1 + $0x28] sm:$0xff]  ;;  %s203_s5 = smov [#allocation2]   ;;  %s125_s9 = sshll.u32 %s269_s3, 4  ;;  %s126_s9 = int_to_ptr.hbm [resolvable:$true] %s125_s9 }
   0x4   :  { %v99_v3 = vsel %vm76_vm0, %v173_v2, 0  ;;  %v96_v5 = vsel %vm76_vm0, %v172_v4, 0  ;;  %v171_v6 = vld [vmem:[%s267_s1 + $0x20] sm:$0xff]  ;;  %v170_v8 = vld [vmem:[%s267_s1 + $0x18] sm:$0xff]  ;;  %v169_v10 = vld [vmem:[%s267_s1 + $0x10] sm:$0xff]  ;;  %s123_s6 = sshll.u32 %s203_s5, 4  ;;  %s124_s6 = int_to_ptr.vmem [resolvable:$true] %s123_s6 }
   0x5   :  { %v93_v7 = vsel %vm76_vm0, %v171_v6, 0  ;;  %v90_v9 = vsel %vm76_vm0, %v170_v8, 0  ;;  %v87_v11 = vsel %vm76_vm0, %v169_v10, 0  ;;  %v168_v12 = vld [vmem:[%s267_s1 + $0x8] sm:$0xff]  ;;  %v167_v14 = vld [vmem:[%s267_s1] sm:$0xff] }
   0x6   :  { %v84_v13 = vsel %vm76_vm0, %v168_v12, 0  ;;  %v81_v15 = vsel %vm76_vm0, %v167_v14, 0  ;;  %v15_v16 = vld [vmem:[%s266_s0] sm:$0xf] }
   0x7   :  { %v176_v17 = vld [vmem:[%s268_s2] ss:$0 sm:$0xff] }
   0xb   :  { %105 = vmatpush.bf16.xpose.msra.mxu0 %v99_v3 }
  0x13   :  { %106 = vmatpush.bf16.xpose.msra.mxu0 %v96_v5 }
  0x1b   :  { %107 = vmatpush.bf16.xpose.msra.mxu0 %v93_v7 }
  0x23   :  { %108 = vmatpush.bf16.xpose.msra.mxu0 %v90_v9 }
  0x2b   :  { %109 = vmatpush.bf16.xpose.msra.mxu0 %v87_v11 }
  0x33   :  { %110 = vmatpush.bf16.xpose.msra.mxu0 %v84_v13 }
  0x3b   :  { %111 = vmatpush.bf16.xpose.msra.mxu0 %v81_v15 }
  0x42   :  { %166 = vmatmul.msk.bf16.vlgmr.msra.gmra.mxu0 %vm76_vm0, %v15_v16 }
  0xbf   :  { %v113_v18 = vpop.f32.mrf.mxu0 }
  0xc0   :  { %v114_v19 = vadd.f32 %v176_v17, %v113_v18 }
  0xc2   :  { %117 = vst [vmem:[#allocation2] sm:$0xff] %v114_v19 }
  0xc3   :  { %128 = dma.vmem_to_hbm [thread:$0]  %s124_s6, 128, %s126_s9, [#allocation3]  }
  0xc7   :  { %v115_v20 = vpop.f32.mrf.mxu0 }
  0xc8   :  { %201 = dma.done.wait [#allocation3], 128  }
  0xc9   :  { %202 = vsyncadd [#allocation3], 4294967168 }
  0xca   :  { %133 = vsyncpa [#allocation3], 1 }

// kernel: bert_pretrain_forward.27
= control target key start
LH: loop header
LB: loop body
LE: loop exit
PB: predicated region body
PF: predicated region fallthrough
CT: control target
= control target key end

     0   :  { %vm36_vm0 = vcmask 261120   ;;  %vm55_vm1 = vcmask 253952   ;;  %s110_s1 = inlined_call_operand.vmem [shape: bf16[32,32], index: 1, kind: input, shape index: {}]   ;;  %s111_s2 = inlined_call_operand.vmem [shape: f32[1,32], index: 2, kind: input, shape index: {}]   ;;  %s112_s0 = inlined_call_operand.vmem [shape: bf16[2,32], index: 0, kind: input, shape index: {}]   ;;  %s113_s3 = inlined_call_operand.vmem [shape: bf16[2,32], index: 3, kind: output, shape index: {}]  }
   0x1   :  { %v71_v0 = vld [vmem:[%s110_s1 + $0x8] sm:$0xff]  ;;  %v70_v1 = vld [vmem:[%s110_s1] sm:$0xff] }
   0x2   :  { %46 = vmatpush.bf16.msra.mxu0 %v71_v0  ;;  %v15_v2 = vld [vmem:[%s112_s0] sm:$0x1] }
   0x3   :  { %v72_v3 = vld [vmem:[%s111_s2] ss:$0 sm:$0xff] }
   0x6   :  { %47 = vmatpush.bf16.msra.mxu0 %v70_v1 }
   0x9   :  { %69 = vmatmul.msk.bf16.vlgmr.msra.gmra.mxu0 %vm36_vm0, %v15_v2 }
  0x86   :  { %v49_v4 = vpop.f32.mrf.mxu0 }
  0x87   :  { %v50_v5 = vadd.f32 %v72_v3, %v49_v4 }
  0x89   :  { %73 = vtanh.f32 %v50_v5 }
  0x8e   :  { %v51_v6 = vpop.f32.mrf.mxu0 }
  0x8f   :  { %v74_v7 = vpop.eup %73 }
  0x90   :  { %v54_v8 = vpack.c.bf16 %v74_v7, %v74_v7 }
  0x92   :  { %56 = vst.msk [vmem:[%s113_s3] sm:$0x1] %vm55_vm1, %v54_v8 }

// kernel: bert_pretrain_forward.28
= control target key start
LH: loop header
LB: loop body
LE: loop exit
PB: predicated region body
PF: predicated region fallthrough
CT: control target
= control target key end

     0   :  { %s147_s0 = inlined_call_operand.vmem [shape: bf16[2,32], index: 0, kind: input, shape index: {}]   ;;  %s148_s1 = inlined_call_operand.vmem [shape: bf16[32,2], index: 1, kind: input, shape index: {}]   ;;  %s149_s2 = inlined_call_operand.vmem [shape: f32[1,2], index: 2, kind: input, shape index: {}]   ;;  %s150_s3 = inlined_call_operand.hbm [shape: f32[2,2], index: 3, kind: output, shape index: {}]  }
   0x1   :  { %v82_v0 = vld [vmem:[%s148_s1 + $0x8] sm:$0xff] }
   0x2   :  { %8 = vsyncpa [#allocation3], 0  ;;  %47 = vmatpush.bf16.msra.mxu0 %v82_v0  ;;  %v81_v1 = vld [vmem:[%s148_s1] sm:$0xff]  ;;  %vm37_vm0 = vcmask 261120   ;;  %s111_s20 = smov [#allocation2]   ;;  %s63_s24 = sshll.u32 %s150_s3, 4  ;;  %s64_s24 = int_to_ptr.hbm [resolvable:$true] %s63_s24 }
   0x3   :  { %v16_v2 = vld [vmem:[%s147_s0] sm:$0x1]  ;;  %s61_s21 = sshll.u32 %s111_s20, 4  ;;  %vm54_vm1 = vcmask 9216   ;;  %s62_s21 = int_to_ptr.vmem [resolvable:$true] %s61_s21 }
   0x4   :  { %v84_v3 = vld [vmem:[%s149_s2] ss:$0 sm:$0xff] }
   0x6   :  { %48 = vmatpush.bf16.msra.mxu0 %v81_v1 }
   0x9   :  { %80 = vmatmul.msk.bf16.vlgmr.msra.gmra.mxu0 %vm37_vm0, %v16_v2 }
  0x86   :  { %v50_v4 = vpop.f32.mrf.mxu0 }
  0x87   :  { %v51_v5 = vadd.f32 %v84_v3, %v50_v4 }
  0x89   :  { %55 = vst.msk [vmem:[#allocation2] sm:$0x3] %vm54_vm1, %v51_v5 }
  0x8a   :  { %66 = dma.vmem_to_hbm [thread:$0]  %s62_s21, 32, %s64_s24, [#allocation3]  }
  0x8e   :  { %v52_v6 = vpop.f32.mrf.mxu0 }
  0x8f   :  { %109 = dma.done.wait [#allocation3], 32  }
  0x90   :  { %110 = vsyncadd [#allocation3], 4294967264 }
  0x91   :  { %71 = vsyncpa [#allocation3], 1 }

</bundles_post_ra>
